<compile_context>
chip_gen: v5e
topology: v5e:2x2
jax: 0.10.0
libtpu: 0.0.40
codegen_flags: <defaults>
</compile_context>

<pallas_src>
import functools

import jax
import jax.numpy as jnp
from jax import lax
from jax.experimental import pallas as pl
from jax.experimental.pallas import tpu as pltpu

EPS = 1e-5
LANE = 128
_VMEM_LIMIT = 48 * 1024 * 1024  # leaves headroom under v7x's 64 MiB physical VMEM


def _round_up(x, m):
    return -(-x // m) * m


def _pick_row_tile(ho, wo, cpad, itemsize=4, budget=2 << 20):
    """Largest divisor of `ho` whose (tho*wo, cpad) f32 accumulator fits `budget`."""
    divisors = [d for d in range(1, ho + 1) if ho % d == 0]
    legal = [d for d in divisors if d == ho or (d * wo) % 8 == 0]
    fitting = [d for d in legal if d * wo * cpad * itemsize <= budget]
    if fitting:
        return max(fitting)
    return min(legal)  # `ho` is always legal, so this never fails


# ---------------------------------------------------------------------------
# Pallas kernel: implicit-im2col conv + folded-BN bias (+ residual | + fused
# 1x1 projection) (+ ReLU).  Entire kh*kw reduction happens in one invocation.
# ---------------------------------------------------------------------------
def _make_conv_kernel(*, kh, kw, stride, tho, wo, relu, mode):
    s = stride
    rows = tho * wo

    def kernel(*refs):
        if mode == "plain":
            x_ref, w_ref, b_ref, o_ref, acc_ref = refs
        elif mode == "residual":
            x_ref, w_ref, b_ref, r_ref, o_ref, acc_ref = refs
        else:  # "skipconv"
            x_ref, w_ref, b_ref, sx_ref, sw_ref, sb_ref, o_ref, acc_ref = refs

        oh0 = pl.program_id(1) * tho
        acc_ref[...] = jnp.zeros_like(acc_ref)

        # Implicit im2col: unrolled reduction over the kh*kw taps. Each tap reads a
        # unit-stride window of the phase-split input and issues one MXU matmul.
        for ky in range(kh):
            for kx in range(kw):
                t = ky * kw + kx
                ph = (ky % s) * s + (kx % s)          # phase (space-to-depth slot)
                xs = x_ref[ph, pl.ds(oh0 + ky // s, tho), pl.ds(kx // s, wo), :]
                xs = xs.reshape(rows, xs.shape[-1])
                acc_ref[...] += jnp.dot(xs, w_ref[t],
                                        preferred_element_type=jnp.float32)

        out = acc_ref[...] + b_ref[...]
        if mode == "residual":
            out = out + r_ref[...].astype(jnp.float32)
        elif mode == "skipconv":
            out = out + jnp.dot(sx_ref[...], sw_ref[...],
                                preferred_element_type=jnp.float32) + sb_ref[...]
        if relu:
            out = jnp.maximum(out, 0.0)
        o_ref[...] = out.astype(o_ref.dtype)

    return kernel


# ---------------------------------------------------------------------------
# Wrapper: phase-split glue + pallas_call.  Returns (N, Ho, Wo, Cpad) where
# Cpad = round_up(Cout, 128) and channels >= Cout are exact zeros (lane-dense
# output that can be fed straight into the next conv).
# ---------------------------------------------------------------------------
def conv_bn_act(x, w_hwio, bias, *, stride=1, relu=True, residual=None, skip=None,
                compute_dtype=jnp.float32, out_dtype=jnp.float32):
    n, h, w, cx = x.shape
    kh, kw, cin, cout = w_hwio.shape
    s = stride
    pad = (kh - 1) // 2
    ho = (h + 2 * pad - kh) // s + 1
    wo = (w + 2 * pad - kw) // s + 1
    cpad = _round_up(cout, LANE)

    # Fold lane padding into the weights: pad Cin up to the (possibly lane-padded)
    # activation channel count with zero rows, pad Cout up to a multiple of 128 with
    # zero columns (so the padded output lanes are exact zeros).
    wk = w_hwio
    if cx > cin:
        wk = jnp.pad(wk, ((0, 0), (0, 0), (0, cx - cin), (0, 0)))
    wk = jnp.pad(wk, ((0, 0), (0, 0), (0, 0), (0, cpad - cout)))
    wk = wk.reshape(kh * kw, cx, cpad).astype(compute_dtype)
    bk = jnp.pad(bias, (0, cpad - cout)).reshape(1, cpad).astype(jnp.float32)

    # Phase-split (space-to-depth) padded input: one pass over the activation instead
    # of a kh*kw-times materialized im2col.  For stride==1 this is just the padded x.
    hp, wp = h + 2 * pad, w + 2 * pad
    hpp, wpp = _round_up(hp, s) // s, _round_up(wp, s) // s
    xp = jnp.pad(x, ((0, 0),
                     (pad, pad + hpp * s - hp),
                     (pad, pad + wpp * s - wp),
                     (0, 0)))
    xph = (xp.reshape(n, hpp, s, wpp, s, cx)
             .transpose(0, 2, 4, 1, 3, 5)
             .reshape(n * s * s, hpp, wpp, cx)
             .astype(compute_dtype))

    tho = _pick_row_tile(ho, wo, cpad)
    rows = tho * wo
    grid = (n, ho // tho)

    mode = "plain"
    operands = [xph, wk, bk]
    in_specs = [
        pl.BlockSpec((s * s, hpp, wpp, cx), lambda i, j: (i, 0, 0, 0)),
        pl.BlockSpec((kh * kw, cx, cpad), lambda i, j: (0, 0, 0)),
        pl.BlockSpec((1, cpad), lambda i, j: (0, 0)),
    ]
    extra_flops = 0
    extra_bytes = 0

    if residual is not None:
        mode = "residual"
        cr = residual.shape[-1]
        r = residual
        if cr < cpad:
            r = jnp.pad(r, ((0, 0), (0, 0), (0, 0), (0, cpad - cr)))
        r = r.reshape(n, ho * wo, cpad)
        operands.append(r)
        in_specs.append(pl.BlockSpec((None, rows, cpad), lambda i, j: (i, j, 0)))
        extra_bytes = r.size * r.dtype.itemsize
    elif skip is not None:
        mode = "skipconv"
        sx, sw, sb = skip
        scin = sx.shape[-1]
        sxf = sx.reshape(n, ho * wo, scin).astype(compute_dtype)
        swk = jnp.pad(sw.reshape(scin, cout),
                      ((0, 0), (0, cpad - cout))).astype(compute_dtype)
        sbk = jnp.pad(sb, (0, cpad - cout)).reshape(1, cpad).astype(jnp.float32)
        operands += [sxf, swk, sbk]
        in_specs += [
            pl.BlockSpec((None, rows, scin), lambda i, j: (i, j, 0)),
            pl.BlockSpec((scin, cpad), lambda i, j: (0, 0)),
            pl.BlockSpec((1, cpad), lambda i, j: (0, 0)),
        ]
        extra_flops = 2 * n * ho * wo * scin * cpad
        extra_bytes = sxf.size * sxf.dtype.itemsize + swk.size * swk.dtype.itemsize

    kernel = _make_conv_kernel(kh=kh, kw=kw, stride=s, tho=tho, wo=wo,
                               relu=relu, mode=mode)
    flops = 2 * n * ho * wo * (kh * kw * cx) * cpad + extra_flops
    bytes_accessed = (xph.size * xph.dtype.itemsize
                      + wk.size * wk.dtype.itemsize
                      + n * ho * wo * cpad * jnp.dtype(out_dtype).itemsize
                      + extra_bytes)

    out = pl.pallas_call(
        kernel,
        out_shape=jax.ShapeDtypeStruct((n, ho * wo, cpad), out_dtype),
        grid=grid,
        in_specs=in_specs,
        out_specs=pl.BlockSpec((None, rows, cpad), lambda i, j: (i, j, 0)),
        scratch_shapes=[pltpu.VMEM((rows, cpad), jnp.float32)],
        compiler_params=pltpu.CompilerParams(
            dimension_semantics=("parallel", "parallel"),
            vmem_limit_bytes=_VMEM_LIMIT,
        ),
        cost_estimate=pl.CostEstimate(flops=flops, transcendentals=0,
                                      bytes_accessed=bytes_accessed),
    )(*operands)
    return out.reshape(n, ho, wo, cpad)


# ---------------------------------------------------------------------------
# ResidualBlock forward (Pallas path)
# ---------------------------------------------------------------------------
def residual_block_pallas(x_nchw, params, *, in_c, out_c, stride,
                          compute_dtype=jnp.float32):
    # TODO(synk): in a full network keep activations NHWC end-to-end and hoist these
    # two transposes to the model boundary; kept here to preserve the per-block
    # PyTorch NCHW interface.
    x = jnp.transpose(x_nchw, (0, 2, 3, 1))  # NCHW -> NHWC
    has_proj = (in_c != out_c) or (stride != 1)

    out1 = conv_bn_act(x, params["w1"], params["b1"], stride=stride, relu=True,
                       compute_dtype=compute_dtype)
    if has_proj:
        # fuse the 1x1 projection skip into the second conv's kernel
        skip_x = x[:, ::stride, ::stride, :]
        out2 = conv_bn_act(out1, params["w2"], params["b2"], stride=1, relu=True,
                           skip=(skip_x, params["w_skip"], params["b_skip"]),
                           compute_dtype=compute_dtype)
    else:
        out2 = conv_bn_act(out1, params["w2"], params["b2"], stride=1, relu=True,
                           residual=x, compute_dtype=compute_dtype)

    out2 = out2[..., :out_c]                  # drop lane padding once, at the end
    return jnp.transpose(out2, (0, 3, 1, 2))  # NHWC -> NCHW


# ---------------------------------------------------------------------------
# Pure-JAX reference (mirrors the PyTorch module, BN in eval mode)
# ---------------------------------------------------------------------------
def residual_block_ref(x, raw, *, in_c, out_c, stride):
    def conv(x, w_oihw, s):
        pad = (w_oihw.shape[2] - 1) // 2
        return lax.conv_general_dilated(
            x, w_oihw, (s, s), [(pad, pad), (pad, pad)],
            dimension_numbers=("NCHW", "OIHW", "NCHW"))

    def bn(x, g, b, m, v):
        g, b, m, v = (t[None, :, None, None] for t in (g, b, m, v))
        return (x - m) / jnp.sqrt(v + EPS) * g + b

    if in_c != out_c or stride != 1:
        identity = bn(conv(x, raw["w_skip"], stride), *raw["bn_skip"])
    else:
        identity = x
    out = jnp.maximum(bn(conv(x, raw["w1"], stride), *raw["bn1"]), 0.0)
    out = bn(conv(out, raw["w2"], 1), *raw["bn2"]) + identity
    return jnp.maximum(out, 0.0)


# ---------------------------------------------------------------------------
# Deterministic parameter construction (raw for reference, BN folded for Pallas)
# ---------------------------------------------------------------------------
def make_params(key, in_c, out_c):
    ks = jax.random.split(key, 15)

    def bn_params(k0, k1, k2, k3, c):
        gamma = 0.5 + jax.random.uniform(k0, (c,), jnp.float32)
        beta = 0.1 * jax.random.normal(k1, (c,), jnp.float32)
        mean = 0.1 * jax.random.normal(k2, (c,), jnp.float32)
        var = 0.5 + jax.random.uniform(k3, (c,), jnp.float32)
        return gamma, beta, mean, var

    raw = {
        "w1": 0.1 * jax.random.normal(ks[0], (out_c, in_c, 3, 3), jnp.float32),
        "bn1": bn_params(ks[1], ks[2], ks[3], ks[4], out_c),
        "w2": 0.1 * jax.random.normal(ks[5], (out_c, out_c, 3, 3), jnp.float32),
        "bn2": bn_params(ks[6], ks[7], ks[8], ks[9], out_c),
        "w_skip": 0.1 * jax.random.normal(ks[10], (out_c, in_c, 1, 1), jnp.float32),
        "bn_skip": bn_params(ks[11], ks[12], ks[13], ks[14], out_c),
    }

    def fold(w_oihw, bn):
        g, b, m, v = bn
        s = g / jnp.sqrt(v + EPS)
        w_hwio = jnp.transpose(w_oihw, (2, 3, 1, 0)) * s  # BN scale folded into Cout
        return w_hwio, b - m * s

    w1, b1 = fold(raw["w1"], raw["bn1"])
    w2, b2 = fold(raw["w2"], raw["bn2"])
    ws, bs = fold(raw["w_skip"], raw["bn_skip"])
    folded = {"w1": w1, "b1": b1, "w2": w2, "b2": b2, "w_skip": ws, "b_skip": bs}
    return raw, folded


if __name__ == "__main__":
    N, in_c, out_c, H, W, stride = 2, 4, 8, 16, 16, 2

    key = jax.random.PRNGKey(0)
    kx, kp = jax.random.split(key)
    x = jax.random.normal(kx, (N, in_c, H, W), jnp.float32)
    raw_params, folded_params = make_params(kp, in_c, out_c)

    ref = residual_block_ref(x, raw_params, in_c=in_c, out_c=out_c, stride=stride)

    # f32 MXU path (exact-ish check against the XLA reference).
    fwd_f32 = jax.jit(functools.partial(residual_block_pallas, in_c=in_c,
                                        out_c=out_c, stride=stride,
                                        compute_dtype=jnp.float32))
    out = jax.block_until_ready(fwd_f32(x, folded_params))
    assert out.shape == ref.shape == (N, out_c, H // stride, W // stride), out.shape
    assert jnp.allclose(out, ref, rtol=2e-4, atol=2e-4), \
        float(jnp.max(jnp.abs(out - ref)))

    # bf16 MXU path (production default on v5e/v6e/v7x), looser tolerance.
    fwd_bf16 = jax.jit(functools.partial(residual_block_pallas, in_c=in_c,
                                         out_c=out_c, stride=stride,
                                         compute_dtype=jnp.bfloat16))
    out_bf16 = jax.block_until_ready(fwd_bf16(x, folded_params))
    assert jnp.allclose(out_bf16, ref, rtol=5e-2, atol=5e-2), \
        float(jnp.max(jnp.abs(out_bf16 - ref)))

    # Also exercise the identity-skip branch (in_c == out_c, stride == 1).
    raw2, folded2 = make_params(kp, out_c, out_c)
    x2 = jax.random.normal(kx, (N, out_c, H, W), jnp.float32)
    ref2 = residual_block_ref(x2, raw2, in_c=out_c, out_c=out_c, stride=1)
    fwd_id = jax.jit(functools.partial(residual_block_pallas, in_c=out_c,
                                       out_c=out_c, stride=1,
                                       compute_dtype=jnp.float32))
    out_id = jax.block_until_ready(fwd_id(x2, folded2))
    assert jnp.allclose(out_id, ref2, rtol=2e-4, atol=2e-4), \
        float(jnp.max(jnp.abs(out_id - ref2)))

    print("KERNEL_OK")
</pallas_src>

<mosaic_0001>
module attributes {stable_mosaic.version = 11 : i64} {
  func.func @kernel(%arg0: i32, %arg1: i32, %arg2: memref<4x9x9x4xf32, #tpu.memory_space<vmem>>, %arg3: memref<9x4x128xf32, #tpu.memory_space<vmem>>, %arg4: memref<1x128xf32, #tpu.memory_space<vmem>>, %arg5: memref<1x64x128xf32, #tpu.memory_space<vmem>>, %arg6: memref<64x128xf32, #tpu.memory_space<vmem>>) attributes {dimension_semantics = [#tpu.dimension_semantics<parallel>, #tpu.dimension_semantics<parallel>], iteration_bounds = array<i64: 2, 1>, scalar_prefetch = 0 : i64, scratch_operands = 1 : i64, tpu.core_type = #tpu.core_type<tc>, window_params = [{transform_indices = @transform_0, window_bounds = array<i64: 4, 9, 9, 4>}, {pipeline_mode = #tpu.pipeline_mode<synchronous>, transform_indices = @transform_1, window_bounds = array<i64: 9, 4, 128>}, {pipeline_mode = #tpu.pipeline_mode<synchronous>, transform_indices = @transform_2, window_bounds = array<i64: 1, 128>}, {transform_indices = @transform_3, window_bounds = array<i64: 1, 64, 128>}]} {
    %c8_i32 = arith.constant 8 : i32
    %0 = arith.muli %arg1, %c8_i32 : i32
    %cst = arith.constant 0.000000e+00 : f32
    %1 = vector.broadcast %cst : f32 to vector<64x128xf32>
    %c0 = arith.constant 0 : index
    %c0_0 = arith.constant 0 : index
    %2 = vector.load %arg6[%c0, %c0_0] : memref<64x128xf32, #tpu.memory_space<vmem>>, vector<64x128xf32>
    tpu.vector_store %arg6[%c0, %c0_0], %1 {strides = array<i32>} : memref<64x128xf32, #tpu.memory_space<vmem>>, vector<64x128xf32>,
    %c0_i32 = arith.constant 0 : i32
    %3 = arith.addi %0, %c0_i32 : i32
    %c0_1 = arith.constant 0 : index
    %4 = arith.index_cast %3 : i32 to index
    %c0_2 = arith.constant 0 : index
    %c0_3 = arith.constant 0 : index
    %5 = vector.load %arg2[%c0_1, %4, %c0_2, %c0_3] : memref<4x9x9x4xf32, #tpu.memory_space<vmem>>, vector<1x8x8x4xf32>
    %6 = vector.shape_cast %5 : vector<1x8x8x4xf32> to vector<8x8x4xf32>
    %7 = vector.shape_cast %6 : vector<8x8x4xf32> to vector<64x4xf32>
    %c0_4 = arith.constant 0 : index
    %c0_5 = arith.constant 0 : index
    %8 = vector.load %arg6[%c0_4, %c0_5] : memref<64x128xf32, #tpu.memory_space<vmem>>, vector<64x128xf32>
    %c0_6 = arith.constant 0 : index
    %c0_7 = arith.constant 0 : index
    %c0_8 = arith.constant 0 : index
    %9 = vector.load %arg3[%c0_6, %c0_7, %c0_8] : memref<9x4x128xf32, #tpu.memory_space<vmem>>, vector<1x4x128xf32>
    %10 = vector.shape_cast %9 : vector<1x4x128xf32> to vector<4x128xf32>
    %cst_9 = arith.constant dense<0.000000e+00> : vector<64x128xf32>
    %11 = tpu.matmul %7, %10, %cst_9 {dimension_numbers = #tpu.dot_dimension_numbers<[1], [0], [0], [1], [0, 0, 1, 1], [], []>} : vector<64x4xf32>, vector<4x128xf32>, vector<64x128xf32> -> vector<64x128xf32>
    %12 = arith.addf %8, %11 : vector<64x128xf32>
    %c0_10 = arith.constant 0 : index
    %c0_11 = arith.constant 0 : index
    %13 = vector.load %arg6[%c0_10, %c0_11] : memref<64x128xf32, #tpu.memory_space<vmem>>, vector<64x128xf32>
    tpu.vector_store %arg6[%c0_10, %c0_11], %12 {strides = array<i32>} : memref<64x128xf32, #tpu.memory_space<vmem>>, vector<64x128xf32>,
    %c0_i32_12 = arith.constant 0 : i32
    %14 = arith.addi %0, %c0_i32_12 : i32
    %c1 = arith.constant 1 : index
    %15 = arith.index_cast %14 : i32 to index
    %c0_13 = arith.constant 0 : index
    %c0_14 = arith.constant 0 : index
    %16 = vector.load %arg2[%c1, %15, %c0_13, %c0_14] : memref<4x9x9x4xf32, #tpu.memory_space<vmem>>, vector<1x8x8x4xf32>
    %17 = vector.shape_cast %16 : vector<1x8x8x4xf32> to vector<8x8x4xf32>
    %18 = vector.shape_cast %17 : vector<8x8x4xf32> to vector<64x4xf32>
    %c0_15 = arith.constant 0 : index
    %c0_16 = arith.constant 0 : index
    %19 = vector.load %arg6[%c0_15, %c0_16] : memref<64x128xf32, #tpu.memory_space<vmem>>, vector<64x128xf32>
    %c1_17 = arith.constant 1 : index
    %c0_18 = arith.constant 0 : index
    %c0_19 = arith.constant 0 : index
    %20 = vector.load %arg3[%c1_17, %c0_18, %c0_19] : memref<9x4x128xf32, #tpu.memory_space<vmem>>, vector<1x4x128xf32>
    %21 = vector.shape_cast %20 : vector<1x4x128xf32> to vector<4x128xf32>
    %cst_20 = arith.constant dense<0.000000e+00> : vector<64x128xf32>
    %22 = tpu.matmul %18, %21, %cst_20 {dimension_numbers = #tpu.dot_dimension_numbers<[1], [0], [0], [1], [0, 0, 1, 1], [], []>} : vector<64x4xf32>, vector<4x128xf32>, vector<64x128xf32> -> vector<64x128xf32>
    %23 = arith.addf %19, %22 : vector<64x128xf32>
    %c0_21 = arith.constant 0 : index
    %c0_22 = arith.constant 0 : index
    %24 = vector.load %arg6[%c0_21, %c0_22] : memref<64x128xf32, #tpu.memory_space<vmem>>, vector<64x128xf32>
    tpu.vector_store %arg6[%c0_21, %c0_22], %23 {strides = array<i32>} : memref<64x128xf32, #tpu.memory_space<vmem>>, vector<64x128xf32>,
    %c0_i32_23 = arith.constant 0 : i32
    %25 = arith.addi %0, %c0_i32_23 : i32
    %c0_24 = arith.constant 0 : index
    %26 = arith.index_cast %25 : i32 to index
    %c1_25 = arith.constant 1 : index
    %c0_26 = arith.constant 0 : index
    %27 = vector.load %arg2[%c0_24, %26, %c1_25, %c0_26] : memref<4x9x9x4xf32, #tpu.memory_space<vmem>>, vector<1x8x8x4xf32>
    %28 = vector.shape_cast %27 : vector<1x8x8x4xf32> to vector<8x8x4xf32>
    %29 = vector.shape_cast %28 : vector<8x8x4xf32> to vector<64x4xf32>
    %c0_27 = arith.constant 0 : index
    %c0_28 = arith.constant 0 : index
    %30 = vector.load %arg6[%c0_27, %c0_28] : memref<64x128xf32, #tpu.memory_space<vmem>>, vector<64x128xf32>
    %c2 = arith.constant 2 : index
    %c0_29 = arith.constant 0 : index
    %c0_30 = arith.constant 0 : index
    %31 = vector.load %arg3[%c2, %c0_29, %c0_30] : memref<9x4x128xf32, #tpu.memory_space<vmem>>, vector<1x4x128xf32>
    %32 = vector.shape_cast %31 : vector<1x4x128xf32> to vector<4x128xf32>
    %cst_31 = arith.constant dense<0.000000e+00> : vector<64x128xf32>
    %33 = tpu.matmul %29, %32, %cst_31 {dimension_numbers = #tpu.dot_dimension_numbers<[1], [0], [0], [1], [0, 0, 1, 1], [], []>} : vector<64x4xf32>, vector<4x128xf32>, vector<64x128xf32> -> vector<64x128xf32>
    %34 = arith.addf %30, %33 : vector<64x128xf32>
    %c0_32 = arith.constant 0 : index
    %c0_33 = arith.constant 0 : index
    %35 = vector.load %arg6[%c0_32, %c0_33] : memref<64x128xf32, #tpu.memory_space<vmem>>, vector<64x128xf32>
    tpu.vector_store %arg6[%c0_32, %c0_33], %34 {strides = array<i32>} : memref<64x128xf32, #tpu.memory_space<vmem>>, vector<64x128xf32>,
    %c0_i32_34 = arith.constant 0 : i32
    %36 = arith.addi %0, %c0_i32_34 : i32
    %c2_35 = arith.constant 2 : index
    %37 = arith.index_cast %36 : i32 to index
    %c0_36 = arith.constant 0 : index
    %c0_37 = arith.constant 0 : index
    %38 = vector.load %arg2[%c2_35, %37, %c0_36, %c0_37] : memref<4x9x9x4xf32, #tpu.memory_space<vmem>>, vector<1x8x8x4xf32>
    %39 = vector.shape_cast %38 : vector<1x8x8x4xf32> to vector<8x8x4xf32>
    %40 = vector.shape_cast %39 : vector<8x8x4xf32> to vector<64x4xf32>
    %c0_38 = arith.constant 0 : index
    %c0_39 = arith.constant 0 : index
    %41 = vector.load %arg6[%c0_38, %c0_39] : memref<64x128xf32, #tpu.memory_space<vmem>>, vector<64x128xf32>
    %c3 = arith.constant 3 : index
    %c0_40 = arith.constant 0 : index
    %c0_41 = arith.constant 0 : index
    %42 = vector.load %arg3[%c3, %c0_40, %c0_41] : memref<9x4x128xf32, #tpu.memory_space<vmem>>, vector<1x4x128xf32>
    %43 = vector.shape_cast %42 : vector<1x4x128xf32> to vector<4x128xf32>
    %cst_42 = arith.constant dense<0.000000e+00> : vector<64x128xf32>
    %44 = tpu.matmul %40, %43, %cst_42 {dimension_numbers = #tpu.dot_dimension_numbers<[1], [0], [0], [1], [0, 0, 1, 1], [], []>} : vector<64x4xf32>, vector<4x128xf32>, vector<64x128xf32> -> vector<64x128xf32>
    %45 = arith.addf %41, %44 : vector<64x128xf32>
    %c0_43 = arith.constant 0 : index
    %c0_44 = arith.constant 0 : index
    %46 = vector.load %arg6[%c0_43, %c0_44] : memref<64x128xf32, #tpu.memory_space<vmem>>, vector<64x128xf32>
    tpu.vector_store %arg6[%c0_43, %c0_44], %45 {strides = array<i32>} : memref<64x128xf32, #tpu.memory_space<vmem>>, vector<64x128xf32>,
    %c0_i32_45 = arith.constant 0 : i32
    %47 = arith.addi %0, %c0_i32_45 : i32
    %c3_46 = arith.constant 3 : index
    %48 = arith.index_cast %47 : i32 to index
    %c0_47 = arith.constant 0 : index
    %c0_48 = arith.constant 0 : index
    %49 = vector.load %arg2[%c3_46, %48, %c0_47, %c0_48] : memref<4x9x9x4xf32, #tpu.memory_space<vmem>>, vector<1x8x8x4xf32>
    %50 = vector.shape_cast %49 : vector<1x8x8x4xf32> to vector<8x8x4xf32>
    %51 = vector.shape_cast %50 : vector<8x8x4xf32> to vector<64x4xf32>
    %c0_49 = arith.constant 0 : index
    %c0_50 = arith.constant 0 : index
    %52 = vector.load %arg6[%c0_49, %c0_50] : memref<64x128xf32, #tpu.memory_space<vmem>>, vector<64x128xf32>
    %c4 = arith.constant 4 : index
    %c0_51 = arith.constant 0 : index
    %c0_52 = arith.constant 0 : index
    %53 = vector.load %arg3[%c4, %c0_51, %c0_52] : memref<9x4x128xf32, #tpu.memory_space<vmem>>, vector<1x4x128xf32>
    %54 = vector.shape_cast %53 : vector<1x4x128xf32> to vector<4x128xf32>
    %cst_53 = arith.constant dense<0.000000e+00> : vector<64x128xf32>
    %55 = tpu.matmul %51, %54, %cst_53 {dimension_numbers = #tpu.dot_dimension_numbers<[1], [0], [0], [1], [0, 0, 1, 1], [], []>} : vector<64x4xf32>, vector<4x128xf32>, vector<64x128xf32> -> vector<64x128xf32>
    %56 = arith.addf %52, %55 : vector<64x128xf32>
    %c0_54 = arith.constant 0 : index
    %c0_55 = arith.constant 0 : index
    %57 = vector.load %arg6[%c0_54, %c0_55] : memref<64x128xf32, #tpu.memory_space<vmem>>, vector<64x128xf32>
    tpu.vector_store %arg6[%c0_54, %c0_55], %56 {strides = array<i32>} : memref<64x128xf32, #tpu.memory_space<vmem>>, vector<64x128xf32>,
    %c0_i32_56 = arith.constant 0 : i32
    %58 = arith.addi %0, %c0_i32_56 : i32
    %c2_57 = arith.constant 2 : index
    %59 = arith.index_cast %58 : i32 to index
    %c1_58 = arith.constant 1 : index
    %c0_59 = arith.constant 0 : index
    %60 = vector.load %arg2[%c2_57, %59, %c1_58, %c0_59] : memref<4x9x9x4xf32, #tpu.memory_space<vmem>>, vector<1x8x8x4xf32>
    %61 = vector.shape_cast %60 : vector<1x8x8x4xf32> to vector<8x8x4xf32>
    %62 = vector.shape_cast %61 : vector<8x8x4xf32> to vector<64x4xf32>
    %c0_60 = arith.constant 0 : index
    %c0_61 = arith.constant 0 : index
    %63 = vector.load %arg6[%c0_60, %c0_61] : memref<64x128xf32, #tpu.memory_space<vmem>>, vector<64x128xf32>
    %c5 = arith.constant 5 : index
    %c0_62 = arith.constant 0 : index
    %c0_63 = arith.constant 0 : index
    %64 = vector.load %arg3[%c5, %c0_62, %c0_63] : memref<9x4x128xf32, #tpu.memory_space<vmem>>, vector<1x4x128xf32>
    %65 = vector.shape_cast %64 : vector<1x4x128xf32> to vector<4x128xf32>
    %cst_64 = arith.constant dense<0.000000e+00> : vector<64x128xf32>
    %66 = tpu.matmul %62, %65, %cst_64 {dimension_numbers = #tpu.dot_dimension_numbers<[1], [0], [0], [1], [0, 0, 1, 1], [], []>} : vector<64x4xf32>, vector<4x128xf32>, vector<64x128xf32> -> vector<64x128xf32>
    %67 = arith.addf %63, %66 : vector<64x128xf32>
    %c0_65 = arith.constant 0 : index
    %c0_66 = arith.constant 0 : index
    %68 = vector.load %arg6[%c0_65, %c0_66] : memref<64x128xf32, #tpu.memory_space<vmem>>, vector<64x128xf32>
    tpu.vector_store %arg6[%c0_65, %c0_66], %67 {strides = array<i32>} : memref<64x128xf32, #tpu.memory_space<vmem>>, vector<64x128xf32>,
    %c1_i32 = arith.constant 1 : i32
    %69 = arith.addi %0, %c1_i32 : i32
    %c0_67 = arith.constant 0 : index
    %70 = arith.index_cast %69 : i32 to index
    %c0_68 = arith.constant 0 : index
    %c0_69 = arith.constant 0 : index
    %71 = vector.load %arg2[%c0_67, %70, %c0_68, %c0_69] : memref<4x9x9x4xf32, #tpu.memory_space<vmem>>, vector<1x8x8x4xf32>
    %72 = vector.shape_cast %71 : vector<1x8x8x4xf32> to vector<8x8x4xf32>
    %73 = vector.shape_cast %72 : vector<8x8x4xf32> to vector<64x4xf32>
    %c0_70 = arith.constant 0 : index
    %c0_71 = arith.constant 0 : index
    %74 = vector.load %arg6[%c0_70, %c0_71] : memref<64x128xf32, #tpu.memory_space<vmem>>, vector<64x128xf32>
    %c6 = arith.constant 6 : index
    %c0_72 = arith.constant 0 : index
    %c0_73 = arith.constant 0 : index
    %75 = vector.load %arg3[%c6, %c0_72, %c0_73] : memref<9x4x128xf32, #tpu.memory_space<vmem>>, vector<1x4x128xf32>
    %76 = vector.shape_cast %75 : vector<1x4x128xf32> to vector<4x128xf32>
    %cst_74 = arith.constant dense<0.000000e+00> : vector<64x128xf32>
    %77 = tpu.matmul %73, %76, %cst_74 {dimension_numbers = #tpu.dot_dimension_numbers<[1], [0], [0], [1], [0, 0, 1, 1], [], []>} : vector<64x4xf32>, vector<4x128xf32>, vector<64x128xf32> -> vector<64x128xf32>
    %78 = arith.addf %74, %77 : vector<64x128xf32>
    %c0_75 = arith.constant 0 : index
    %c0_76 = arith.constant 0 : index
    %79 = vector.load %arg6[%c0_75, %c0_76] : memref<64x128xf32, #tpu.memory_space<vmem>>, vector<64x128xf32>
    tpu.vector_store %arg6[%c0_75, %c0_76], %78 {strides = array<i32>} : memref<64x128xf32, #tpu.memory_space<vmem>>, vector<64x128xf32>,
    %c1_i32_77 = arith.constant 1 : i32
    %80 = arith.addi %0, %c1_i32_77 : i32
    %c1_78 = arith.constant 1 : index
    %81 = arith.index_cast %80 : i32 to index
    %c0_79 = arith.constant 0 : index
    %c0_80 = arith.constant 0 : index
    %82 = vector.load %arg2[%c1_78, %81, %c0_79, %c0_80] : memref<4x9x9x4xf32, #tpu.memory_space<vmem>>, vector<1x8x8x4xf32>
    %83 = vector.shape_cast %82 : vector<1x8x8x4xf32> to vector<8x8x4xf32>
    %84 = vector.shape_cast %83 : vector<8x8x4xf32> to vector<64x4xf32>
    %c0_81 = arith.constant 0 : index
    %c0_82 = arith.constant 0 : index
    %85 = vector.load %arg6[%c0_81, %c0_82] : memref<64x128xf32, #tpu.memory_space<vmem>>, vector<64x128xf32>
    %c7 = arith.constant 7 : index
    %c0_83 = arith.constant 0 : index
    %c0_84 = arith.constant 0 : index
    %86 = vector.load %arg3[%c7, %c0_83, %c0_84] : memref<9x4x128xf32, #tpu.memory_space<vmem>>, vector<1x4x128xf32>
    %87 = vector.shape_cast %86 : vector<1x4x128xf32> to vector<4x128xf32>
    %cst_85 = arith.constant dense<0.000000e+00> : vector<64x128xf32>
    %88 = tpu.matmul %84, %87, %cst_85 {dimension_numbers = #tpu.dot_dimension_numbers<[1], [0], [0], [1], [0, 0, 1, 1], [], []>} : vector<64x4xf32>, vector<4x128xf32>, vector<64x128xf32> -> vector<64x128xf32>
    %89 = arith.addf %85, %88 : vector<64x128xf32>
    %c0_86 = arith.constant 0 : index
    %c0_87 = arith.constant 0 : index
    %90 = vector.load %arg6[%c0_86, %c0_87] : memref<64x128xf32, #tpu.memory_space<vmem>>, vector<64x128xf32>
    tpu.vector_store %arg6[%c0_86, %c0_87], %89 {strides = array<i32>} : memref<64x128xf32, #tpu.memory_space<vmem>>, vector<64x128xf32>,
    %c1_i32_88 = arith.constant 1 : i32
    %91 = arith.addi %0, %c1_i32_88 : i32
    %c0_89 = arith.constant 0 : index
    %92 = arith.index_cast %91 : i32 to index
    %c1_90 = arith.constant 1 : index
    %c0_91 = arith.constant 0 : index
    %93 = vector.load %arg2[%c0_89, %92, %c1_90, %c0_91] : memref<4x9x9x4xf32, #tpu.memory_space<vmem>>, vector<1x8x8x4xf32>
    %94 = vector.shape_cast %93 : vector<1x8x8x4xf32> to vector<8x8x4xf32>
    %95 = vector.shape_cast %94 : vector<8x8x4xf32> to vector<64x4xf32>
    %c0_92 = arith.constant 0 : index
    %c0_93 = arith.constant 0 : index
    %96 = vector.load %arg6[%c0_92, %c0_93] : memref<64x128xf32, #tpu.memory_space<vmem>>, vector<64x128xf32>
    %c8 = arith.constant 8 : index
    %c0_94 = arith.constant 0 : index
    %c0_95 = arith.constant 0 : index
    %97 = vector.load %arg3[%c8, %c0_94, %c0_95] : memref<9x4x128xf32, #tpu.memory_space<vmem>>, vector<1x4x128xf32>
    %98 = vector.shape_cast %97 : vector<1x4x128xf32> to vector<4x128xf32>
    %cst_96 = arith.constant dense<0.000000e+00> : vector<64x128xf32>
    %99 = tpu.matmul %95, %98, %cst_96 {dimension_numbers = #tpu.dot_dimension_numbers<[1], [0], [0], [1], [0, 0, 1, 1], [], []>} : vector<64x4xf32>, vector<4x128xf32>, vector<64x128xf32> -> vector<64x128xf32>
    %100 = arith.addf %96, %99 : vector<64x128xf32>
    %c0_97 = arith.constant 0 : index
    %c0_98 = arith.constant 0 : index
    %101 = vector.load %arg6[%c0_97, %c0_98] : memref<64x128xf32, #tpu.memory_space<vmem>>, vector<64x128xf32>
    tpu.vector_store %arg6[%c0_97, %c0_98], %100 {strides = array<i32>} : memref<64x128xf32, #tpu.memory_space<vmem>>, vector<64x128xf32>,
    %c0_99 = arith.constant 0 : index
    %c0_100 = arith.constant 0 : index
    %102 = vector.load %arg6[%c0_99, %c0_100] : memref<64x128xf32, #tpu.memory_space<vmem>>, vector<64x128xf32>
    %c0_101 = arith.constant 0 : index
    %c0_102 = arith.constant 0 : index
    %103 = vector.load %arg4[%c0_101, %c0_102] : memref<1x128xf32, #tpu.memory_space<vmem>>, vector<1x128xf32>
    %104 = vector.broadcast %103 : vector<1x128xf32> to vector<64x128xf32>
    %105 = arith.addf %102, %104 : vector<64x128xf32>
    %cst_103 = arith.constant 0.000000e+00 : f32
    %106 = vector.broadcast %cst_103 : f32 to vector<64x128xf32>
    %107 = arith.maximumf %105, %106 : vector<64x128xf32>
    %c0_104 = arith.constant 0 : index
    %c0_105 = arith.constant 0 : index
    %c0_106 = arith.constant 0 : index
    %108 = vector.load %arg5[%c0_104, %c0_105, %c0_106] : memref<1x64x128xf32, #tpu.memory_space<vmem>>, vector<1x64x128xf32>
    %109 = vector.shape_cast %108 : vector<1x64x128xf32> to vector<64x128xf32>
    %110 = vector.shape_cast %107 : vector<64x128xf32> to vector<1x64x128xf32>
    tpu.vector_store %arg5[%c0_104, %c0_105, %c0_106], %110 {strides = array<i32>} : memref<1x64x128xf32, #tpu.memory_space<vmem>>, vector<1x64x128xf32>,
    return
  }
  func.func @transform_0(%arg0: i32, %arg1: i32) -> (i32, i32, i32, i32) {
    %c0_i32 = arith.constant 0 : i32
    %c0_i32_0 = arith.constant 0 : i32
    %c0_i32_1 = arith.constant 0 : i32
    %c0_i32_2 = arith.constant 0 : i32
    return %arg0, %c0_i32, %c0_i32_0, %c0_i32_1 : i32, i32, i32, i32
  }
  func.func @transform_1(%arg0: i32, %arg1: i32) -> (i32, i32, i32) {
    %c0_i32 = arith.constant 0 : i32
    %c0_i32_0 = arith.constant 0 : i32
    %c0_i32_1 = arith.constant 0 : i32
    %c0_i32_2 = arith.constant 0 : i32
    return %c0_i32, %c0_i32_0, %c0_i32_1 : i32, i32, i32
  }
  func.func @transform_2(%arg0: i32, %arg1: i32) -> (i32, i32) {
    %c0_i32 = arith.constant 0 : i32
    %c0_i32_0 = arith.constant 0 : i32
    %c0_i32_1 = arith.constant 0 : i32
    return %c0_i32, %c0_i32_0 : i32, i32
  }
  func.func @transform_3(%arg0: i32, %arg1: i32) -> (i32, i32, i32) {
    %c0_i32 = arith.constant 0 : i32
    %c0_i32_0 = arith.constant 0 : i32
    return %arg0, %arg1, %c0_i32 : i32, i32, i32
  }
}

module attributes {stable_mosaic.version = 11 : i64} {
  func.func @kernel(%arg0: i32, %arg1: i32, %arg2: memref<1x10x10x128xf32, #tpu.memory_space<vmem>>, %arg3: memref<9x128x128xf32, #tpu.memory_space<vmem>>, %arg4: memref<1x128xf32, #tpu.memory_space<vmem>>, %arg5: memref<1x64x4xf32, #tpu.memory_space<vmem>>, %arg6: memref<4x128xf32, #tpu.memory_space<vmem>>, %arg7: memref<1x128xf32, #tpu.memory_space<vmem>>, %arg8: memref<1x64x128xf32, #tpu.memory_space<vmem>>, %arg9: memref<64x128xf32, #tpu.memory_space<vmem>>) attributes {dimension_semantics = [#tpu.dimension_semantics<parallel>, #tpu.dimension_semantics<parallel>], iteration_bounds = array<i64: 2, 1>, scalar_prefetch = 0 : i64, scratch_operands = 1 : i64, tpu.core_type = #tpu.core_type<tc>, window_params = [{transform_indices = @transform_0, window_bounds = array<i64: 1, 10, 10, 128>}, {pipeline_mode = #tpu.pipeline_mode<synchronous>, transform_indices = @transform_1, window_bounds = array<i64: 9, 128, 128>}, {pipeline_mode = #tpu.pipeline_mode<synchronous>, transform_indices = @transform_2, window_bounds = array<i64: 1, 128>}, {transform_indices = @transform_3, window_bounds = array<i64: 1, 64, 4>}, {pipeline_mode = #tpu.pipeline_mode<synchronous>, transform_indices = @transform_4, window_bounds = array<i64: 4, 128>}, {pipeline_mode = #tpu.pipeline_mode<synchronous>, transform_indices = @transform_5, window_bounds = array<i64: 1, 128>}, {transform_indices = @transform_6, window_bounds = array<i64: 1, 64, 128>}]} {
    %c8_i32 = arith.constant 8 : i32
    %0 = arith.muli %arg1, %c8_i32 : i32
    %cst = arith.constant 0.000000e+00 : f32
    %1 = vector.broadcast %cst : f32 to vector<64x128xf32>
    %c0 = arith.constant 0 : index
    %c0_0 = arith.constant 0 : index
    %2 = vector.load %arg9[%c0, %c0_0] : memref<64x128xf32, #tpu.memory_space<vmem>>, vector<64x128xf32>
    tpu.vector_store %arg9[%c0, %c0_0], %1 {strides = array<i32>} : memref<64x128xf32, #tpu.memory_space<vmem>>, vector<64x128xf32>,
    %c0_i32 = arith.constant 0 : i32
    %3 = arith.addi %0, %c0_i32 : i32
    %c0_1 = arith.constant 0 : index
    %4 = arith.index_cast %3 : i32 to index
    %c0_2 = arith.constant 0 : index
    %c0_3 = arith.constant 0 : index
    %5 = vector.load %arg2[%c0_1, %4, %c0_2, %c0_3] : memref<1x10x10x128xf32, #tpu.memory_space<vmem>>, vector<1x8x8x128xf32>
    %6 = vector.shape_cast %5 : vector<1x8x8x128xf32> to vector<8x8x128xf32>
    %7 = vector.shape_cast %6 : vector<8x8x128xf32> to vector<64x128xf32>
    %c0_4 = arith.constant 0 : index
    %c0_5 = arith.constant 0 : index
    %8 = vector.load %arg9[%c0_4, %c0_5] : memref<64x128xf32, #tpu.memory_space<vmem>>, vector<64x128xf32>
    %c0_6 = arith.constant 0 : index
    %c0_7 = arith.constant 0 : index
    %c0_8 = arith.constant 0 : index
    %9 = vector.load %arg3[%c0_6, %c0_7, %c0_8] : memref<9x128x128xf32, #tpu.memory_space<vmem>>, vector<1x128x128xf32>
    %10 = vector.shape_cast %9 : vector<1x128x128xf32> to vector<128x128xf32>
    %cst_9 = arith.constant dense<0.000000e+00> : vector<64x128xf32>
    %11 = tpu.matmul %7, %10, %cst_9 {dimension_numbers = #tpu.dot_dimension_numbers<[1], [0], [0], [1], [0, 0, 1, 1], [], []>} : vector<64x128xf32>, vector<128x128xf32>, vector<64x128xf32> -> vector<64x128xf32>
    %12 = arith.addf %8, %11 : vector<64x128xf32>
    %c0_10 = arith.constant 0 : index
    %c0_11 = arith.constant 0 : index
    %13 = vector.load %arg9[%c0_10, %c0_11] : memref<64x128xf32, #tpu.memory_space<vmem>>, vector<64x128xf32>
    tpu.vector_store %arg9[%c0_10, %c0_11], %12 {strides = array<i32>} : memref<64x128xf32, #tpu.memory_space<vmem>>, vector<64x128xf32>,
    %c0_i32_12 = arith.constant 0 : i32
    %14 = arith.addi %0, %c0_i32_12 : i32
    %c0_13 = arith.constant 0 : index
    %15 = arith.index_cast %14 : i32 to index
    %c1 = arith.constant 1 : index
    %c0_14 = arith.constant 0 : index
    %16 = vector.load %arg2[%c0_13, %15, %c1, %c0_14] : memref<1x10x10x128xf32, #tpu.memory_space<vmem>>, vector<1x8x8x128xf32>
    %17 = vector.shape_cast %16 : vector<1x8x8x128xf32> to vector<8x8x128xf32>
    %18 = vector.shape_cast %17 : vector<8x8x128xf32> to vector<64x128xf32>
    %c0_15 = arith.constant 0 : index
    %c0_16 = arith.constant 0 : index
    %19 = vector.load %arg9[%c0_15, %c0_16] : memref<64x128xf32, #tpu.memory_space<vmem>>, vector<64x128xf32>
    %c1_17 = arith.constant 1 : index
    %c0_18 = arith.constant 0 : index
    %c0_19 = arith.constant 0 : index
    %20 = vector.load %arg3[%c1_17, %c0_18, %c0_19] : memref<9x128x128xf32, #tpu.memory_space<vmem>>, vector<1x128x128xf32>
    %21 = vector.shape_cast %20 : vector<1x128x128xf32> to vector<128x128xf32>
    %cst_20 = arith.constant dense<0.000000e+00> : vector<64x128xf32>
    %22 = tpu.matmul %18, %21, %cst_20 {dimension_numbers = #tpu.dot_dimension_numbers<[1], [0], [0], [1], [0, 0, 1, 1], [], []>} : vector<64x128xf32>, vector<128x128xf32>, vector<64x128xf32> -> vector<64x128xf32>
    %23 = arith.addf %19, %22 : vector<64x128xf32>
    %c0_21 = arith.constant 0 : index
    %c0_22 = arith.constant 0 : index
    %24 = vector.load %arg9[%c0_21, %c0_22] : memref<64x128xf32, #tpu.memory_space<vmem>>, vector<64x128xf32>
    tpu.vector_store %arg9[%c0_21, %c0_22], %23 {strides = array<i32>} : memref<64x128xf32, #tpu.memory_space<vmem>>, vector<64x128xf32>,
    %c0_i32_23 = arith.constant 0 : i32
    %25 = arith.addi %0, %c0_i32_23 : i32
    %c0_24 = arith.constant 0 : index
    %26 = arith.index_cast %25 : i32 to index
    %c2 = arith.constant 2 : index
    %c0_25 = arith.constant 0 : index
    %27 = vector.load %arg2[%c0_24, %26, %c2, %c0_25] : memref<1x10x10x128xf32, #tpu.memory_space<vmem>>, vector<1x8x8x128xf32>
    %28 = vector.shape_cast %27 : vector<1x8x8x128xf32> to vector<8x8x128xf32>
    %29 = vector.shape_cast %28 : vector<8x8x128xf32> to vector<64x128xf32>
    %c0_26 = arith.constant 0 : index
    %c0_27 = arith.constant 0 : index
    %30 = vector.load %arg9[%c0_26, %c0_27] : memref<64x128xf32, #tpu.memory_space<vmem>>, vector<64x128xf32>
    %c2_28 = arith.constant 2 : index
    %c0_29 = arith.constant 0 : index
    %c0_30 = arith.constant 0 : index
    %31 = vector.load %arg3[%c2_28, %c0_29, %c0_30] : memref<9x128x128xf32, #tpu.memory_space<vmem>>, vector<1x128x128xf32>
    %32 = vector.shape_cast %31 : vector<1x128x128xf32> to vector<128x128xf32>
    %cst_31 = arith.constant dense<0.000000e+00> : vector<64x128xf32>
    %33 = tpu.matmul %29, %32, %cst_31 {dimension_numbers = #tpu.dot_dimension_numbers<[1], [0], [0], [1], [0, 0, 1, 1], [], []>} : vector<64x128xf32>, vector<128x128xf32>, vector<64x128xf32> -> vector<64x128xf32>
    %34 = arith.addf %30, %33 : vector<64x128xf32>
    %c0_32 = arith.constant 0 : index
    %c0_33 = arith.constant 0 : index
    %35 = vector.load %arg9[%c0_32, %c0_33] : memref<64x128xf32, #tpu.memory_space<vmem>>, vector<64x128xf32>
    tpu.vector_store %arg9[%c0_32, %c0_33], %34 {strides = array<i32>} : memref<64x128xf32, #tpu.memory_space<vmem>>, vector<64x128xf32>,
    %c1_i32 = arith.constant 1 : i32
    %36 = arith.addi %0, %c1_i32 : i32
    %c0_34 = arith.constant 0 : index
    %37 = arith.index_cast %36 : i32 to index
    %c0_35 = arith.constant 0 : index
    %c0_36 = arith.constant 0 : index
    %38 = vector.load %arg2[%c0_34, %37, %c0_35, %c0_36] : memref<1x10x10x128xf32, #tpu.memory_space<vmem>>, vector<1x8x8x128xf32>
    %39 = vector.shape_cast %38 : vector<1x8x8x128xf32> to vector<8x8x128xf32>
    %40 = vector.shape_cast %39 : vector<8x8x128xf32> to vector<64x128xf32>
    %c0_37 = arith.constant 0 : index
    %c0_38 = arith.constant 0 : index
    %41 = vector.load %arg9[%c0_37, %c0_38] : memref<64x128xf32, #tpu.memory_space<vmem>>, vector<64x128xf32>
    %c3 = arith.constant 3 : index
    %c0_39 = arith.constant 0 : index
    %c0_40 = arith.constant 0 : index
    %42 = vector.load %arg3[%c3, %c0_39, %c0_40] : memref<9x128x128xf32, #tpu.memory_space<vmem>>, vector<1x128x128xf32>
    %43 = vector.shape_cast %42 : vector<1x128x128xf32> to vector<128x128xf32>
    %cst_41 = arith.constant dense<0.000000e+00> : vector<64x128xf32>
    %44 = tpu.matmul %40, %43, %cst_41 {dimension_numbers = #tpu.dot_dimension_numbers<[1], [0], [0], [1], [0, 0, 1, 1], [], []>} : vector<64x128xf32>, vector<128x128xf32>, vector<64x128xf32> -> vector<64x128xf32>
    %45 = arith.addf %41, %44 : vector<64x128xf32>
    %c0_42 = arith.constant 0 : index
    %c0_43 = arith.constant 0 : index
    %46 = vector.load %arg9[%c0_42, %c0_43] : memref<64x128xf32, #tpu.memory_space<vmem>>, vector<64x128xf32>
    tpu.vector_store %arg9[%c0_42, %c0_43], %45 {strides = array<i32>} : memref<64x128xf32, #tpu.memory_space<vmem>>, vector<64x128xf32>,
    %c1_i32_44 = arith.constant 1 : i32
    %47 = arith.addi %0, %c1_i32_44 : i32
    %c0_45 = arith.constant 0 : index
    %48 = arith.index_cast %47 : i32 to index
    %c1_46 = arith.constant 1 : index
    %c0_47 = arith.constant 0 : index
    %49 = vector.load %arg2[%c0_45, %48, %c1_46, %c0_47] : memref<1x10x10x128xf32, #tpu.memory_space<vmem>>, vector<1x8x8x128xf32>
    %50 = vector.shape_cast %49 : vector<1x8x8x128xf32> to vector<8x8x128xf32>
    %51 = vector.shape_cast %50 : vector<8x8x128xf32> to vector<64x128xf32>
    %c0_48 = arith.constant 0 : index
    %c0_49 = arith.constant 0 : index
    %52 = vector.load %arg9[%c0_48, %c0_49] : memref<64x128xf32, #tpu.memory_space<vmem>>, vector<64x128xf32>
    %c4 = arith.constant 4 : index
    %c0_50 = arith.constant 0 : index
    %c0_51 = arith.constant 0 : index
    %53 = vector.load %arg3[%c4, %c0_50, %c0_51] : memref<9x128x128xf32, #tpu.memory_space<vmem>>, vector<1x128x128xf32>
    %54 = vector.shape_cast %53 : vector<1x128x128xf32> to vector<128x128xf32>
    %cst_52 = arith.constant dense<0.000000e+00> : vector<64x128xf32>
    %55 = tpu.matmul %51, %54, %cst_52 {dimension_numbers = #tpu.dot_dimension_numbers<[1], [0], [0], [1], [0, 0, 1, 1], [], []>} : vector<64x128xf32>, vector<128x128xf32>, vector<64x128xf32> -> vector<64x128xf32>
    %56 = arith.addf %52, %55 : vector<64x128xf32>
    %c0_53 = arith.constant 0 : index
    %c0_54 = arith.constant 0 : index
    %57 = vector.load %arg9[%c0_53, %c0_54] : memref<64x128xf32, #tpu.memory_space<vmem>>, vector<64x128xf32>
    tpu.vector_store %arg9[%c0_53, %c0_54], %56 {strides = array<i32>} : memref<64x128xf32, #tpu.memory_space<vmem>>, vector<64x128xf32>,
    %c1_i32_55 = arith.constant 1 : i32
    %58 = arith.addi %0, %c1_i32_55 : i32
    %c0_56 = arith.constant 0 : index
    %59 = arith.index_cast %58 : i32 to index
    %c2_57 = arith.constant 2 : index
    %c0_58 = arith.constant 0 : index
    %60 = vector.load %arg2[%c0_56, %59, %c2_57, %c0_58] : memref<1x10x10x128xf32, #tpu.memory_space<vmem>>, vector<1x8x8x128xf32>
    %61 = vector.shape_cast %60 : vector<1x8x8x128xf32> to vector<8x8x128xf32>
    %62 = vector.shape_cast %61 : vector<8x8x128xf32> to vector<64x128xf32>
    %c0_59 = arith.constant 0 : index
    %c0_60 = arith.constant 0 : index
    %63 = vector.load %arg9[%c0_59, %c0_60] : memref<64x128xf32, #tpu.memory_space<vmem>>, vector<64x128xf32>
    %c5 = arith.constant 5 : index
    %c0_61 = arith.constant 0 : index
    %c0_62 = arith.constant 0 : index
    %64 = vector.load %arg3[%c5, %c0_61, %c0_62] : memref<9x128x128xf32, #tpu.memory_space<vmem>>, vector<1x128x128xf32>
    %65 = vector.shape_cast %64 : vector<1x128x128xf32> to vector<128x128xf32>
    %cst_63 = arith.constant dense<0.000000e+00> : vector<64x128xf32>
    %66 = tpu.matmul %62, %65, %cst_63 {dimension_numbers = #tpu.dot_dimension_numbers<[1], [0], [0], [1], [0, 0, 1, 1], [], []>} : vector<64x128xf32>, vector<128x128xf32>, vector<64x128xf32> -> vector<64x128xf32>
    %67 = arith.addf %63, %66 : vector<64x128xf32>
    %c0_64 = arith.constant 0 : index
    %c0_65 = arith.constant 0 : index
    %68 = vector.load %arg9[%c0_64, %c0_65] : memref<64x128xf32, #tpu.memory_space<vmem>>, vector<64x128xf32>
    tpu.vector_store %arg9[%c0_64, %c0_65], %67 {strides = array<i32>} : memref<64x128xf32, #tpu.memory_space<vmem>>, vector<64x128xf32>,
    %c2_i32 = arith.constant 2 : i32
    %69 = arith.addi %0, %c2_i32 : i32
    %c0_66 = arith.constant 0 : index
    %70 = arith.index_cast %69 : i32 to index
    %c0_67 = arith.constant 0 : index
    %c0_68 = arith.constant 0 : index
    %71 = vector.load %arg2[%c0_66, %70, %c0_67, %c0_68] : memref<1x10x10x128xf32, #tpu.memory_space<vmem>>, vector<1x8x8x128xf32>
    %72 = vector.shape_cast %71 : vector<1x8x8x128xf32> to vector<8x8x128xf32>
    %73 = vector.shape_cast %72 : vector<8x8x128xf32> to vector<64x128xf32>
    %c0_69 = arith.constant 0 : index
    %c0_70 = arith.constant 0 : index
    %74 = vector.load %arg9[%c0_69, %c0_70] : memref<64x128xf32, #tpu.memory_space<vmem>>, vector<64x128xf32>
    %c6 = arith.constant 6 : index
    %c0_71 = arith.constant 0 : index
    %c0_72 = arith.constant 0 : index
    %75 = vector.load %arg3[%c6, %c0_71, %c0_72] : memref<9x128x128xf32, #tpu.memory_space<vmem>>, vector<1x128x128xf32>
    %76 = vector.shape_cast %75 : vector<1x128x128xf32> to vector<128x128xf32>
    %cst_73 = arith.constant dense<0.000000e+00> : vector<64x128xf32>
    %77 = tpu.matmul %73, %76, %cst_73 {dimension_numbers = #tpu.dot_dimension_numbers<[1], [0], [0], [1], [0, 0, 1, 1], [], []>} : vector<64x128xf32>, vector<128x128xf32>, vector<64x128xf32> -> vector<64x128xf32>
    %78 = arith.addf %74, %77 : vector<64x128xf32>
    %c0_74 = arith.constant 0 : index
    %c0_75 = arith.constant 0 : index
    %79 = vector.load %arg9[%c0_74, %c0_75] : memref<64x128xf32, #tpu.memory_space<vmem>>, vector<64x128xf32>
    tpu.vector_store %arg9[%c0_74, %c0_75], %78 {strides = array<i32>} : memref<64x128xf32, #tpu.memory_space<vmem>>, vector<64x128xf32>,
    %c2_i32_76 = arith.constant 2 : i32
    %80 = arith.addi %0, %c2_i32_76 : i32
    %c0_77 = arith.constant 0 : index
    %81 = arith.index_cast %80 : i32 to index
    %c1_78 = arith.constant 1 : index
    %c0_79 = arith.constant 0 : index
    %82 = vector.load %arg2[%c0_77, %81, %c1_78, %c0_79] : memref<1x10x10x128xf32, #tpu.memory_space<vmem>>, vector<1x8x8x128xf32>
    %83 = vector.shape_cast %82 : vector<1x8x8x128xf32> to vector<8x8x128xf32>
    %84 = vector.shape_cast %83 : vector<8x8x128xf32> to vector<64x128xf32>
    %c0_80 = arith.constant 0 : index
    %c0_81 = arith.constant 0 : index
    %85 = vector.load %arg9[%c0_80, %c0_81] : memref<64x128xf32, #tpu.memory_space<vmem>>, vector<64x128xf32>
    %c7 = arith.constant 7 : index
    %c0_82 = arith.constant 0 : index
    %c0_83 = arith.constant 0 : index
    %86 = vector.load %arg3[%c7, %c0_82, %c0_83] : memref<9x128x128xf32, #tpu.memory_space<vmem>>, vector<1x128x128xf32>
    %87 = vector.shape_cast %86 : vector<1x128x128xf32> to vector<128x128xf32>
    %cst_84 = arith.constant dense<0.000000e+00> : vector<64x128xf32>
    %88 = tpu.matmul %84, %87, %cst_84 {dimension_numbers = #tpu.dot_dimension_numbers<[1], [0], [0], [1], [0, 0, 1, 1], [], []>} : vector<64x128xf32>, vector<128x128xf32>, vector<64x128xf32> -> vector<64x128xf32>
    %89 = arith.addf %85, %88 : vector<64x128xf32>
    %c0_85 = arith.constant 0 : index
    %c0_86 = arith.constant 0 : index
    %90 = vector.load %arg9[%c0_85, %c0_86] : memref<64x128xf32, #tpu.memory_space<vmem>>, vector<64x128xf32>
    tpu.vector_store %arg9[%c0_85, %c0_86], %89 {strides = array<i32>} : memref<64x128xf32, #tpu.memory_space<vmem>>, vector<64x128xf32>,
    %c2_i32_87 = arith.constant 2 : i32
    %91 = arith.addi %0, %c2_i32_87 : i32
    %c0_88 = arith.constant 0 : index
    %92 = arith.index_cast %91 : i32 to index
    %c2_89 = arith.constant 2 : index
    %c0_90 = arith.constant 0 : index
    %93 = vector.load %arg2[%c0_88, %92, %c2_89, %c0_90] : memref<1x10x10x128xf32, #tpu.memory_space<vmem>>, vector<1x8x8x128xf32>
    %94 = vector.shape_cast %93 : vector<1x8x8x128xf32> to vector<8x8x128xf32>
    %95 = vector.shape_cast %94 : vector<8x8x128xf32> to vector<64x128xf32>
    %c0_91 = arith.constant 0 : index
    %c0_92 = arith.constant 0 : index
    %96 = vector.load %arg9[%c0_91, %c0_92] : memref<64x128xf32, #tpu.memory_space<vmem>>, vector<64x128xf32>
    %c8 = arith.constant 8 : index
    %c0_93 = arith.constant 0 : index
    %c0_94 = arith.constant 0 : index
    %97 = vector.load %arg3[%c8, %c0_93, %c0_94] : memref<9x128x128xf32, #tpu.memory_space<vmem>>, vector<1x128x128xf32>
    %98 = vector.shape_cast %97 : vector<1x128x128xf32> to vector<128x128xf32>
    %cst_95 = arith.constant dense<0.000000e+00> : vector<64x128xf32>
    %99 = tpu.matmul %95, %98, %cst_95 {dimension_numbers = #tpu.dot_dimension_numbers<[1], [0], [0], [1], [0, 0, 1, 1], [], []>} : vector<64x128xf32>, vector<128x128xf32>, vector<64x128xf32> -> vector<64x128xf32>
    %100 = arith.addf %96, %99 : vector<64x128xf32>
    %c0_96 = arith.constant 0 : index
    %c0_97 = arith.constant 0 : index
    %101 = vector.load %arg9[%c0_96, %c0_97] : memref<64x128xf32, #tpu.memory_space<vmem>>, vector<64x128xf32>
    tpu.vector_store %arg9[%c0_96, %c0_97], %100 {strides = array<i32>} : memref<64x128xf32, #tpu.memory_space<vmem>>, vector<64x128xf32>,
    %c0_98 = arith.constant 0 : index
    %c0_99 = arith.constant 0 : index
    %102 = vector.load %arg9[%c0_98, %c0_99] : memref<64x128xf32, #tpu.memory_space<vmem>>, vector<64x128xf32>
    %c0_100 = arith.constant 0 : index
    %c0_101 = arith.constant 0 : index
    %103 = vector.load %arg4[%c0_100, %c0_101] : memref<1x128xf32, #tpu.memory_space<vmem>>, vector<1x128xf32>
    %104 = vector.broadcast %103 : vector<1x128xf32> to vector<64x128xf32>
    %105 = arith.addf %102, %104 : vector<64x128xf32>
    %c0_102 = arith.constant 0 : index
    %c0_103 = arith.constant 0 : index
    %c0_104 = arith.constant 0 : index
    %106 = vector.load %arg5[%c0_102, %c0_103, %c0_104] : memref<1x64x4xf32, #tpu.memory_space<vmem>>, vector<1x64x4xf32>
    %107 = vector.shape_cast %106 : vector<1x64x4xf32> to vector<64x4xf32>
    %c0_105 = arith.constant 0 : index
    %c0_106 = arith.constant 0 : index
    %108 = vector.load %arg6[%c0_105, %c0_106] : memref<4x128xf32, #tpu.memory_space<vmem>>, vector<4x128xf32>
    %cst_107 = arith.constant dense<0.000000e+00> : vector<64x128xf32>
    %109 = tpu.matmul %107, %108, %cst_107 {dimension_numbers = #tpu.dot_dimension_numbers<[1], [0], [0], [1], [0, 0, 1, 1], [], []>} : vector<64x4xf32>, vector<4x128xf32>, vector<64x128xf32> -> vector<64x128xf32>
    %110 = arith.addf %105, %109 : vector<64x128xf32>
    %c0_108 = arith.constant 0 : index
    %c0_109 = arith.constant 0 : index
    %111 = vector.load %arg7[%c0_108, %c0_109] : memref<1x128xf32, #tpu.memory_space<vmem>>, vector<1x128xf32>
    %112 = vector.broadcast %111 : vector<1x128xf32> to vector<64x128xf32>
    %113 = arith.addf %110, %112 : vector<64x128xf32>
    %cst_110 = arith.constant 0.000000e+00 : f32
    %114 = vector.broadcast %cst_110 : f32 to vector<64x128xf32>
    %115 = arith.maximumf %113, %114 : vector<64x128xf32>
    %c0_111 = arith.constant 0 : index
    %c0_112 = arith.constant 0 : index
    %c0_113 = arith.constant 0 : index
    %116 = vector.load %arg8[%c0_111, %c0_112, %c0_113] : memref<1x64x128xf32, #tpu.memory_space<vmem>>, vector<1x64x128xf32>
    %117 = vector.shape_cast %116 : vector<1x64x128xf32> to vector<64x128xf32>
    %118 = vector.shape_cast %115 : vector<64x128xf32> to vector<1x64x128xf32>
    tpu.vector_store %arg8[%c0_111, %c0_112, %c0_113], %118 {strides = array<i32>} : memref<1x64x128xf32, #tpu.memory_space<vmem>>, vector<1x64x128xf32>,
    return
  }
  func.func @transform_0(%arg0: i32, %arg1: i32) -> (i32, i32, i32, i32) {
    %c0_i32 = arith.constant 0 : i32
    %c0_i32_0 = arith.constant 0 : i32
    %c0_i32_1 = arith.constant 0 : i32
    %c0_i32_2 = arith.constant 0 : i32
    return %arg0, %c0_i32, %c0_i32_0, %c0_i32_1 : i32, i32, i32, i32
  }
  func.func @transform_1(%arg0: i32, %arg1: i32) -> (i32, i32, i32) {
    %c0_i32 = arith.constant 0 : i32
    %c0_i32_0 = arith.constant 0 : i32
    %c0_i32_1 = arith.constant 0 : i32
    %c0_i32_2 = arith.constant 0 : i32
    return %c0_i32, %c0_i32_0, %c0_i32_1 : i32, i32, i32
  }
  func.func @transform_2(%arg0: i32, %arg1: i32) -> (i32, i32) {
    %c0_i32 = arith.constant 0 : i32
    %c0_i32_0 = arith.constant 0 : i32
    %c0_i32_1 = arith.constant 0 : i32
    return %c0_i32, %c0_i32_0 : i32, i32
  }
  func.func @transform_3(%arg0: i32, %arg1: i32) -> (i32, i32, i32) {
    %c0_i32 = arith.constant 0 : i32
    %c0_i32_0 = arith.constant 0 : i32
    return %arg0, %arg1, %c0_i32 : i32, i32, i32
  }
  func.func @transform_4(%arg0: i32, %arg1: i32) -> (i32, i32) {
    %c0_i32 = arith.constant 0 : i32
    %c0_i32_0 = arith.constant 0 : i32
    %c0_i32_1 = arith.constant 0 : i32
    return %c0_i32, %c0_i32_0 : i32, i32
  }
  func.func @transform_5(%arg0: i32, %arg1: i32) -> (i32, i32) {
    %c0_i32 = arith.constant 0 : i32
    %c0_i32_0 = arith.constant 0 : i32
    %c0_i32_1 = arith.constant 0 : i32
    return %c0_i32, %c0_i32_0 : i32, i32
  }
  func.func @transform_6(%arg0: i32, %arg1: i32) -> (i32, i32, i32) {
    %c0_i32 = arith.constant 0 : i32
    %c0_i32_0 = arith.constant 0 : i32
    return %arg0, %arg1, %c0_i32 : i32, i32, i32
  }
}

</mosaic_0001>

<bundles_post_ra>
// kernel: residual_block_pallas.2
= control target key start
LH: loop header
LB: loop body
LE: loop exit
PB: predicated region body
PF: predicated region fallthrough
CT: control target
= control target key end

     0   :  { %s1506_s12 = smov 0   ;;  %s1508_s13 = smov 0   ;;  %s1828_s0 = inlined_call_operand.vmem [shape: f32[8,9,9,4], index: 0, kind: input, shape index: {}]   ;;  %s1829_s1 = inlined_call_operand.vmem [shape: f32[9,4,128], index: 1, kind: input, shape index: {}]   ;;  %s1830_s2 = inlined_call_operand.vmem [shape: f32[1,128], index: 2, kind: input, shape index: {}]   ;;  %s1831_s3 = inlined_call_operand.vmem [shape: f32[2,64,128], index: 3, kind: output, shape index: {}]  }
   0x1   :  { %s1510_s14 = smov 0  }
   0x2 LB: > { %s25_s15 = sadd.s32 1, %s1480_s13  ;;  %p1280_p0 = scmp.ge.s32.totalorder %s1484_s14, 1  ;;  %s1484_s14 = sphi %s1510_s14, %s13_s14   ;;  %s1480_s13 = sphi %s1508_s13, %s1833_s13   ;;  %s1476_s12 = sphi %s1506_s12, %s1832_s12  }
   0x3   : > { %p27_p1 = scmp.ge.s32.totalorder %s25_s15, 2  ;;  %p153_p2 = scmp.lt.s32.totalorder %s1484_s14, 3 }
   0x5   : > { %s1835_s15 = smov (%p27_p1, %s25_s15), 0  ;;  %p154_p3 = pnand %p1280_p0, %p153_p2 }
   0x6   : > { %s1281_s18 = sshll.u32 (!%p154_p3), %s1476_s12, 2  ;;  %p190_p5 = scmp.lt.s32.totalorder (!%p154_p3), %s1476_s12, 1 }
   0x7   : > { %157 = sbr.rel (%p154_p3) target bundleno = 298 (0x12a), region = 32  ;;  %p183_p4 = scmp.lt.s32.totalorder (!%p154_p3), %s1281_s18, 7 }
   0xc   : > { %v226_v0 = vld [vmem:[%s1829_s1] sm:$0xf]  ;;  %vm252_vm0 = vcmask 1043456   ;;  %v1312_v1 = vld [vmem:[%s1829_s1 + $0x8] sm:$0xf]  ;;  %s1837_s18 = smov (!%p183_p4, %s1281_s18), 7 }
   0xd   : > { %1433 = vmatpush.msk.msra.mxu1 %vm252_vm0, %v226_v0  ;;  %1434 = vmatpush.msk.msra.mxu2 %vm252_vm0, %v226_v0  ;;  %v1330_v2 = vld [vmem:[%s1829_s1 + $0xc] sm:$0xf]  ;;  %v1302_v3 = vld [vmem:[%s1829_s1 + $0x4] sm:$0xf]  ;;  %v1348_v4 = vld [vmem:[%s1829_s1 + $0x10] sm:$0xf] }
   0xe   : > { %1435 = vmatpush.msk.msra.mxu3 %vm252_vm0, %v226_v0  ;;  %1285 = vmatpush.msk.msra.mxu0 %vm252_vm0, %v226_v0  ;;  %s1436_s27 = smul.u32 144, %s1837_s18  ;;  %vm227_vm1 = vcmask 31744   ;;  %v1384_v5 = vld [vmem:[%s1829_s1 + $0x18] sm:$0xf]  ;;  %v1402_v6 = vld [vmem:[%s1829_s1 + $0x1c] sm:$0xf] }
   0xf   : > { %1313 = vmatpush.msk.msrb.mxu2 %vm252_vm0, %v1312_v1  ;;  %1303 = vmatpush.msk.msrb.mxu1 %vm252_vm0, %v1302_v3  ;;  %v1366_v11 = vld [vmem:[%s1829_s1 + $0x14] sm:$0xf]  ;;  %v1420_v12 = vld [vmem:[%s1829_s1 + $0x20] sm:$0xf]  ;;  %s1839_s12 = smov (!%p190_p5, %s1476_s12), 1 }
  0x10   : > { %1331 = vmatpush.msk.msrb.mxu3 %vm252_vm0, %v1330_v2  ;;  %1349 = vmatpush.msk.msrb.mxu0 %vm252_vm0, %v1348_v4  ;;  %s1553_s30 = scalar_lea.vmem %s1828_s0, %s1436_s27  ;;  %s1432_s18 = sshll.u32 %s1839_s12, 6 }
  0x11   : > { %v1562_v7 = vld [vmem:[%s1553_s30 + $0x20] sm:$0xff]  ;;  %v1589_v13 = vld [vmem:[%s1553_s30 + $0x30] sm:$0xff]  ;;  %s1780_s21 = scalar_lea.vmem %s1831_s3, %s1432_s18 }
  0x12   : > { %v1565_v8 = vld [vmem:[%s1553_s30 + $0x40] sm:$0xff]  ;;  %1288 = vmatmul.msk.f32.vlgmr.msra.gmra.mxu1 %vm227_vm1, %v1562_v7  ;;  %v1592_v14 = vld [vmem:[%s1553_s30 + $0x50] sm:$0xff] }
  0x13   : > { %v1568_v9 = vld [vmem:[%s1553_s30 + $0x60] sm:$0xff]  ;;  %1290 = vmatmul.msk.f32.vlgmr.msra.gmra.mxu2 %vm227_vm1, %v1565_v8  ;;  %1367 = vmatpush.msk.msra.mxu1 %vm252_vm0, %v1366_v11  ;;  %v1595_v15 = vld [vmem:[%s1553_s30 + $0x70] sm:$0xff] }
  0x14   : > { %v210_v10 = vld [vmem:[%s1553_s30] sm:$0xff]  ;;  %1292 = vmatmul.msk.f32.vlgmr.msra.gmra.mxu3 %vm227_vm1, %v1568_v9  ;;  %1385 = vmatpush.msk.msra.mxu2 %vm252_vm0, %v1384_v5  ;;  %v1598_v16 = vld [vmem:[%s1553_s30 + $0x10] sm:$0xff] }
  0x15   : > { %1286 = vmatmul.msk.f32.vlgmr.msra.gmra.mxu0 %vm227_vm1, %v210_v10  ;;  %1403 = vmatpush.msk.msra.mxu3 %vm252_vm0, %v1402_v6  ;;  %v1294_v17 = vld [vmem:[%s1553_s30 + $0x90] sm:$0xff]  ;;  %v417_v18 = vld [vmem:[%s1553_s30 + $0x1] sm:$0xff] }
  0x16   : > { %1421 = vmatpush.msk.msra.mxu0 %vm252_vm0, %v1420_v12  ;;  %v1322_v19 = vld [vmem:[%s1553_s30 + $0x120] sm:$0xff]  ;;  %v1340_v20 = vld [vmem:[%s1553_s30 + $0x1b0] sm:$0xff] }
  0x17   : > { %v1295_v21 = vld [vmem:[%s1553_s30 + $0xa0] sm:$0xff]  ;;  %v418_v22 = vld [vmem:[%s1553_s30 + $0x11] sm:$0xff] }
  0x18   : > { %v1323_v23 = vld [vmem:[%s1553_s30 + $0x130] sm:$0xff]  ;;  %v1341_v24 = vld [vmem:[%s1553_s30 + $0x1c0] sm:$0xff] }
  0x19   : > { %v1296_v25 = vld [vmem:[%s1553_s30 + $0xb0] sm:$0xff]  ;;  %v419_v26 = vld [vmem:[%s1553_s30 + $0x21] sm:$0xff] }
  0x1a   : > { %1289 = vmatmul.msk.f32.gmra.mxu1 %vm227_vm1, %v1589_v13  ;;  %v1324_v27 = vld [vmem:[%s1553_s30 + $0x140] sm:$0xff]  ;;  %v1342_v28 = vld [vmem:[%s1553_s30 + $0x1d0] sm:$0xff] }
  0x1b   : > { %1291 = vmatmul.msk.f32.gmra.mxu2 %vm227_vm1, %v1592_v14  ;;  %v1297_v29 = vld [vmem:[%s1553_s30 + $0xc0] sm:$0xff]  ;;  %v420_v30 = vld [vmem:[%s1553_s30 + $0x31] sm:$0xff] }
  0x1c   : > { %1293 = vmatmul.msk.f32.gmra.mxu3 %vm227_vm1, %v1595_v15  ;;  %v1325_v31 = vld [vmem:[%s1553_s30 + $0x150] sm:$0xff]  ;;  %v1343_v32 = vld [vmem:[%s1553_s30 + $0x1e0] sm:$0xff] }
  0x1d   : > { %1287 = vmatmul.msk.f32.gmra.mxu0 %vm227_vm1, %v1598_v16  ;;  %v1298_v33 = vld [vmem:[%s1553_s30 + $0xd0] sm:$0xff]  ;;  %v421_v34 = vld [vmem:[%s1553_s30 + $0x41] sm:$0xff] }
  0x1e   : > { %v1326_v35 = vld [vmem:[%s1553_s30 + $0x160] sm:$0xff]  ;;  %v1344_v36 = vld [vmem:[%s1553_s30 + $0x1f0] sm:$0xff] }
  0x1f   : > { %v1299_v37 = vld [vmem:[%s1553_s30 + $0xe0] sm:$0xff]  ;;  %v422_v38 = vld [vmem:[%s1553_s30 + $0x51] sm:$0xff] }
  0x20   : > { %v1327_v39 = vld [vmem:[%s1553_s30 + $0x170] sm:$0xff]  ;;  %v1345_v40 = vld [vmem:[%s1553_s30 + $0x200] sm:$0xff] }
  0x21   : > { %v1300_v41 = vld [vmem:[%s1553_s30 + $0xf0] sm:$0xff]  ;;  %v423_v42 = vld [vmem:[%s1553_s30 + $0x61] sm:$0xff] }
  0x22   : > { %1304 = vmatmul.msk.f32.vlgmr.msrb.gmra.mxu1 %vm227_vm1, %v1294_v17  ;;  %v1328_v43 = vld [vmem:[%s1553_s30 + $0x180] sm:$0xff]  ;;  %v1346_v44 = vld [vmem:[%s1553_s30 + $0x210] sm:$0xff] }
  0x23   : > { %1314 = vmatmul.msk.f32.vlgmr.msrb.gmra.mxu2 %vm227_vm1, %v417_v18  ;;  %v1301_v45 = vld [vmem:[%s1553_s30 + $0x100] sm:$0xff]  ;;  %v424_v46 = vld [vmem:[%s1553_s30 + $0x71] sm:$0xff] }
  0x24   : > { %1332 = vmatmul.msk.f32.vlgmr.msrb.gmra.mxu3 %vm227_vm1, %v1322_v19  ;;  %v1329_v47 = vld [vmem:[%s1553_s30 + $0x190] sm:$0xff]  ;;  %v1347_v48 = vld [vmem:[%s1553_s30 + $0x220] sm:$0xff] }
  0x25   : > { %1350 = vmatmul.msk.f32.vlgmr.msrb.gmra.mxu0 %vm227_vm1, %v1340_v20  ;;  %v1358_v49 = vld [vmem:[%s1553_s30 + $0x121] sm:$0xff]  ;;  %v1359_v50 = vld [vmem:[%s1553_s30 + $0x131] sm:$0xff] }
  0x26   : > { %v1360_v51 = vld [vmem:[%s1553_s30 + $0x141] sm:$0xff]  ;;  %v1361_v52 = vld [vmem:[%s1553_s30 + $0x151] sm:$0xff] }
  0x27   : > { %v1362_v53 = vld [vmem:[%s1553_s30 + $0x161] sm:$0xff]  ;;  %v1363_v54 = vld [vmem:[%s1553_s30 + $0x171] sm:$0xff] }
  0x28   : > { %v1364_v56 = vld [vmem:[%s1553_s30 + $0x181] sm:$0xff]  ;;  %v1365_v61 = vld [vmem:[%s1553_s30 + $0x191] sm:$0xff] }
  0x29   : > { %v1383_v62 = vld [vmem:[%s1553_s30 + $0x80] sm:$0xff]  ;;  %v1401_v63 = vld [vmem:[%s1553_s30 + $0x110] sm:$0xff] }
  0x2a   : > { %1305 = vmatmul.msk.f32.gmra.mxu1 %vm227_vm1, %v1295_v21  ;;  %v1419_v1 = vld [vmem:[%s1553_s30 + $0x81] sm:$0xff] }
  0x2b   : > { %1315 = vmatmul.msk.f32.gmra.mxu2 %vm227_vm1, %v418_v22 }
  0x2c   : > { %1333 = vmatmul.msk.f32.gmra.mxu3 %vm227_vm1, %v1323_v23 }
  0x2d   : > { %1351 = vmatmul.msk.f32.gmra.mxu0 %vm227_vm1, %v1341_v24 }
  0x32   : > { %1306 = vmatmul.msk.f32.gmra.mxu1 %vm227_vm1, %v1296_v25 }
  0x33   : > { %1316 = vmatmul.msk.f32.gmra.mxu2 %vm227_vm1, %v419_v26 }
  0x34   : > { %1334 = vmatmul.msk.f32.gmra.mxu3 %vm227_vm1, %v1324_v27 }
  0x35   : > { %1352 = vmatmul.msk.f32.gmra.mxu0 %vm227_vm1, %v1342_v28 }
  0x3a   : > { %1307 = vmatmul.msk.f32.gmra.mxu1 %vm227_vm1, %v1297_v29 }
  0x3b   : > { %1317 = vmatmul.msk.f32.gmra.mxu2 %vm227_vm1, %v420_v30 }
  0x3c   : > { %1335 = vmatmul.msk.f32.gmra.mxu3 %vm227_vm1, %v1325_v31 }
  0x3d   : > { %1353 = vmatmul.msk.f32.gmra.mxu0 %vm227_vm1, %v1343_v32 }
  0x42   : > { %1308 = vmatmul.msk.f32.gmra.mxu1 %vm227_vm1, %v1298_v33 }
  0x43   : > { %1318 = vmatmul.msk.f32.gmra.mxu2 %vm227_vm1, %v421_v34 }
  0x44   : > { %1336 = vmatmul.msk.f32.gmra.mxu3 %vm227_vm1, %v1326_v35 }
  0x45   : > { %1354 = vmatmul.msk.f32.gmra.mxu0 %vm227_vm1, %v1344_v36 }
  0x4a   : > { %1309 = vmatmul.msk.f32.gmra.mxu1 %vm227_vm1, %v1299_v37 }
  0x4b   : > { %1319 = vmatmul.msk.f32.gmra.mxu2 %vm227_vm1, %v422_v38 }
  0x4c   : > { %1337 = vmatmul.msk.f32.gmra.mxu3 %vm227_vm1, %v1327_v39 }
  0x4d   : > { %1355 = vmatmul.msk.f32.gmra.mxu0 %vm227_vm1, %v1345_v40 }
  0x52   : > { %1310 = vmatmul.msk.f32.gmra.mxu1 %vm227_vm1, %v1300_v41 }
  0x53   : > { %1320 = vmatmul.msk.f32.gmra.mxu2 %vm227_vm1, %v423_v42 }
  0x54   : > { %1338 = vmatmul.msk.f32.gmra.mxu3 %vm227_vm1, %v1328_v43 }
  0x55   : > { %1356 = vmatmul.msk.f32.gmra.mxu0 %vm227_vm1, %v1346_v44 }
  0x5a   : > { %1311 = vmatmul.msk.f32.gmra.mxu1 %vm227_vm1, %v1301_v45 }
  0x5b   : > { %1321 = vmatmul.msk.f32.gmra.mxu2 %vm227_vm1, %v424_v46 }
  0x5c   : > { %1339 = vmatmul.msk.f32.gmra.mxu3 %vm227_vm1, %v1329_v47 }
  0x5d   : > { %1357 = vmatmul.msk.f32.gmra.mxu0 %vm227_vm1, %v1347_v48 }
  0x62   : > { %1368 = vmatmul.msk.f32.vlgmr.msra.gmra.mxu1 %vm227_vm1, %v1358_v49 }
  0x63   : > { %1386 = vmatmul.msk.f32.vlgmr.msra.gmra.mxu2 %vm227_vm1, %v1598_v16 }
  0x64   : > { %1404 = vmatmul.msk.f32.vlgmr.msra.gmra.mxu3 %vm227_vm1, %v1295_v21 }
  0x65   : > { %1422 = vmatmul.msk.f32.vlgmr.msra.gmra.mxu0 %vm227_vm1, %v418_v22 }
  0x6a   : > { %1369 = vmatmul.msk.f32.gmra.mxu1 %vm227_vm1, %v1359_v50 }
  0x6b   : > { %1387 = vmatmul.msk.f32.gmra.mxu2 %vm227_vm1, %v1562_v7 }
  0x6c   : > { %1405 = vmatmul.msk.f32.gmra.mxu3 %vm227_vm1, %v1296_v25 }
  0x6d   : > { %1423 = vmatmul.msk.f32.gmra.mxu0 %vm227_vm1, %v419_v26 }
  0x72   : > { %1370 = vmatmul.msk.f32.gmra.mxu1 %vm227_vm1, %v1360_v51 }
  0x73   : > { %1388 = vmatmul.msk.f32.gmra.mxu2 %vm227_vm1, %v1589_v13 }
  0x74   : > { %1406 = vmatmul.msk.f32.gmra.mxu3 %vm227_vm1, %v1297_v29 }
  0x75   : > { %1424 = vmatmul.msk.f32.gmra.mxu0 %vm227_vm1, %v420_v30 }
  0x7a   : > { %1371 = vmatmul.msk.f32.gmra.mxu1 %vm227_vm1, %v1361_v52  ;;  %v1774_v52 = vld [vmem:[%s1830_s2] ss:$0 sm:$0xff] }
  0x7b   : > { %1389 = vmatmul.msk.f32.gmra.mxu2 %vm227_vm1, %v1565_v8 }
  0x7c   : > { %1407 = vmatmul.msk.f32.gmra.mxu3 %vm227_vm1, %v1298_v33 }
  0x7d   : > { %1425 = vmatmul.msk.f32.gmra.mxu0 %vm227_vm1, %v421_v34 }
  0x82   : > { %1372 = vmatmul.msk.f32.gmra.mxu1 %vm227_vm1, %v1362_v53 }
  0x83   : > { %1390 = vmatmul.msk.f32.gmra.mxu2 %vm227_vm1, %v1592_v14 }
  0x84   : > { %1408 = vmatmul.msk.f32.gmra.mxu3 %vm227_vm1, %v1299_v37 }
  0x85   : > { %1426 = vmatmul.msk.f32.gmra.mxu0 %vm227_vm1, %v422_v38 }
  0x8a   : > { %1373 = vmatmul.msk.f32.gmra.mxu1 %vm227_vm1, %v1363_v54 }
  0x8b   : > { %1391 = vmatmul.msk.f32.gmra.mxu2 %vm227_vm1, %v1568_v9 }
  0x8c   : > { %1409 = vmatmul.msk.f32.gmra.mxu3 %vm227_vm1, %v1300_v41 }
  0x8d   : > { %1427 = vmatmul.msk.f32.gmra.mxu0 %vm227_vm1, %v423_v42 }
  0x8f   : > { %v1708_v55 = vpop.f32.mrf.mxu1 }
  0x92   : > { %v273_v57 = vpop.f32.mrf.mxu0  ;;  %1374 = vmatmul.msk.f32.gmra.mxu1 %vm227_vm1, %v1364_v56 }
  0x93   : > { %1392 = vmatmul.msk.f32.gmra.mxu2 %vm227_vm1, %v1595_v15 }
  0x94   : > { %1410 = vmatmul.msk.f32.gmra.mxu3 %vm227_vm1, %v1301_v45 }
  0x95   : > { %1428 = vmatmul.msk.f32.gmra.mxu0 %vm227_vm1, %v424_v46 }
  0x96   : > { %v1716_v58 = vpop.f32.mrf.mxu2 }
  0x97   : > { %v1718_v59 = vpop.f32.mrf.mxu3  ;;  %v1720_v60 = vpop.f32.mrf.mxu1 }
  0x9a   : > { %v276_v0 = vpop.f32.mrf.mxu0  ;;  %1375 = vmatmul.msk.f32.gmra.mxu1 %vm227_vm1, %v1365_v61 }
  0x9b   : > { %1393 = vmatmul.msk.f32.gmra.mxu2 %vm227_vm1, %v1383_v62 }
  0x9c   : > { %1411 = vmatmul.msk.f32.gmra.mxu3 %vm227_vm1, %v1401_v63 }
  0x9d   : > { %1429 = vmatmul.msk.f32.gmra.mxu0 %vm227_vm1, %v1419_v1 }
  0x9e   : > { %v1730_v2 = vpop.f32.mrf.mxu2 }
  0x9f   : > { %v1732_v3 = vpop.f32.mrf.mxu3  ;;  %v377_v4 = vpop.f32.mrf.mxu1 }
  0xa0   : > { %v401_v33 = vadd.f32 %v377_v4, %v273_v57 }
  0xa2   : > { %v687_v5 = vpop.f32.mrf.mxu0 }
  0xa6   : > { %v479_v6 = vpop.f32.mrf.mxu2 }
  0xa7   : > { %v583_v7 = vpop.f32.mrf.mxu3  ;;  %v380_v8 = vpop.f32.mrf.mxu1  ;;  %v503_v35 = vadd.f32 %v479_v6, %v401_v33 }
  0xa8   : > { %v402_v40 = vadd.f32 %v380_v8, %v276_v0 }
  0xa9   : > { %v607_v37 = vadd.f32 %v583_v7, %v503_v35 }
  0xaa   : > { %v690_v9 = vpop.f32.mrf.mxu0 }
  0xab   : > { %v711_v42 = vadd.f32 %v687_v5, %v607_v37 }
  0xae   : > { %v482_v10 = vpop.f32.mrf.mxu2 }
  0xaf   : > { %v586_v11 = vpop.f32.mrf.mxu3  ;;  %v383_v12 = vpop.f32.mrf.mxu1  ;;  %v504_v43 = vadd.f32 %v482_v10, %v402_v40 }
  0xb0   : > { %v403_v50 = vadd.f32 %v383_v12, %v1708_v55 }
  0xb1   : > { %v608_v46 = vadd.f32 %v586_v11, %v504_v43 }
  0xb2   : > { %v693_v13 = vpop.f32.mrf.mxu0 }
  0xb3   : > { %v712_v54 = vadd.f32 %v690_v9, %v608_v46 }
  0xb6   : > { %v485_v14 = vpop.f32.mrf.mxu2 }
  0xb7   : > { %v589_v15 = vpop.f32.mrf.mxu3  ;;  %v386_v16 = vpop.f32.mrf.mxu1  ;;  %v505_v56 = vadd.f32 %v485_v14, %v403_v50 }
  0xb8   : > { %v404_v6 = vadd.f32 %v386_v16, %v1720_v60 }
  0xb9   : > { %v609_v63 = vadd.f32 %v589_v15, %v505_v56 }
  0xba   : > { %v1734_v17 = vpop.f32.mrf.mxu0 }
  0xbb   : > { %v713_v9 = vadd.f32 %v693_v13, %v609_v63 }
  0xbe   : > { %v488_v18 = vpop.f32.mrf.mxu2 }
  0xbf   : > { %v592_v19 = vpop.f32.mrf.mxu3  ;;  %v1736_v20 = vpop.f32.mrf.mxu1  ;;  %v506_v10 = vadd.f32 %v488_v18, %v404_v6 }
  0xc1   : > { %v610_v35 = vadd.f32 %v592_v19, %v506_v10 }
  0xc2   : > { %v1738_v21 = vpop.f32.mrf.mxu0 }
  0xc3   : > { %v714_v13 = vadd.f32 %v1734_v17, %v610_v35 }
  0xc6   : > { %v1740_v22 = vpop.f32.mrf.mxu2 }
  0xc7   : > { %v1742_v23 = vpop.f32.mrf.mxu3  ;;  %v1744_v24 = vpop.f32.mrf.mxu1 }
  0xca   : > { %v1746_v25 = vpop.f32.mrf.mxu0 }
  0xce   : > { %v1748_v26 = vpop.f32.mrf.mxu2 }
  0xcf   : > { %v1750_v27 = vpop.f32.mrf.mxu3  ;;  %v1752_v28 = vpop.f32.mrf.mxu1 }
  0xd2   : > { %v1754_v29 = vpop.f32.mrf.mxu0 }
  0xd6   : > { %v1756_v30 = vpop.f32.mrf.mxu2 }
  0xd7   : > { %v1758_v31 = vpop.f32.mrf.mxu3  ;;  %v1760_v32 = vpop.f32.mrf.mxu1 }
  0xda   : > { %v1762_v34 = vpop.f32.mrf.mxu0 }
  0xde   : > { %v1764_v36 = vpop.f32.mrf.mxu2 }
  0xdf   : > { %v1766_v38 = vpop.f32.mrf.mxu3  ;;  %v789_v39 = vpop.f32.mrf.mxu1 }
  0xe0   : > { %v813_v44 = vadd.f32 %v789_v39, %v711_v42 }
  0xe2   : > { %v1100_v41 = vpop.f32.mrf.mxu0 }
  0xe6   : > { %v894_v45 = vpop.f32.mrf.mxu2 }
  0xe7   : > { %v918_v47 = vadd.f32 %v894_v45, %v813_v44  ;;  %v998_v48 = vpop.f32.mrf.mxu3  ;;  %v792_v49 = vpop.f32.mrf.mxu1 }
  0xe8   : > { %v814_v61 = vadd.f32 %v792_v49, %v712_v54 }
  0xe9   : > { %v1022_v51 = vadd.f32 %v998_v48, %v918_v47 }
  0xea   : > { %v1103_v53 = vpop.f32.mrf.mxu0 }
  0xeb   : > { %v1124_v57 = vadd.f32 %v1100_v41, %v1022_v51  ;;  %v405_v41 = vadd.f32 %v1736_v20, %v1716_v58  ;;  %v406_v58 = vadd.f32 %v1744_v24, %v1730_v2  ;;  %v407_v2 = vadd.f32 %v1752_v28, %v1718_v59 }
  0xec   : > { %v408_v28 = vadd.f32 %v1760_v32, %v1732_v3 }
  0xed   : > { %v1152_v62 = vadd.f32 %v1774_v52, %v1124_v57  ;;  %v507_v18 = vadd.f32 %v1740_v22, %v405_v41  ;;  %v508_v50 = vadd.f32 %v1748_v26, %v406_v58  ;;  %v509_v26 = vadd.f32 %v1756_v30, %v407_v2 }
  0xee   : > { %v897_v55 = vpop.f32.mrf.mxu2 }
  0xef   : > { %v1160_v0 = vmax.f32 %v1152_v62, 0.0  ;;  %v919_v1 = vadd.f32 %v897_v55, %v814_v61  ;;  %v1001_v4 = vpop.f32.mrf.mxu3  ;;  %v795_v5 = vpop.f32.mrf.mxu1  ;;  %v611_v45 = vadd.f32 %v1742_v23, %v507_v18  ;;  %v612_v56 = vadd.f32 %v1750_v27, %v508_v50 }
  0xf0   : > { %v815_v12 = vadd.f32 %v795_v5, %v713_v9  ;;  %v613_v5 = vadd.f32 %v1758_v31, %v509_v26  ;;  %v510_v9 = vadd.f32 %v1764_v36, %v408_v28 }
  0xf1   : > { %1168 = vst [vmem:[%s1780_s21] sm:$0xff] %v1160_v0  ;;  %v1023_v7 = vadd.f32 %v1001_v4, %v919_v1  ;;  %v715_v22 = vadd.f32 %v1738_v21, %v611_v45  ;;  %v716_v21 = vadd.f32 %v1746_v25, %v612_v56 }
  0xf2   : > { %v1106_v8 = vpop.f32.mrf.mxu0  ;;  %v717_v30 = vadd.f32 %v1754_v29, %v613_v5 }
  0xf3   : > { %v1125_v11 = vadd.f32 %v1103_v53, %v1023_v7 }
  0xf5   : > { %v1153_v14 = vadd.f32 %v1774_v52, %v1125_v11 }
  0xf6   : > { %v900_v33 = vpop.f32.mrf.mxu2 }
  0xf7   : > { %v1161_v37 = vmax.f32 %v1153_v14, 0.0  ;;  %v920_v15 = vadd.f32 %v900_v33, %v815_v12  ;;  %v1004_v39 = vpop.f32.mrf.mxu3  ;;  %v798_v40 = vpop.f32.mrf.mxu1  ;;  %v614_v33 = vadd.f32 %v1766_v38, %v510_v9 }
  0xf8   : > { %v816_v43 = vadd.f32 %v798_v40, %v714_v13 }
  0xf9   : > { %1169 = vst [vmem:[%s1780_s21 + $0x8] sm:$0xff] %v1161_v37  ;;  %v1024_v60 = vadd.f32 %v1004_v39, %v920_v15  ;;  %v718_v29 = vadd.f32 %v1762_v34, %v614_v33 }
  0xfa   : > { %v1109_v16 = vpop.f32.mrf.mxu0 }
  0xfb   : > { %v1126_v42 = vadd.f32 %v1106_v8, %v1024_v60 }
  0xfd   : > { %v1154_v44 = vadd.f32 %v1774_v52, %v1126_v42 }
  0xfe   : > { %v903_v19 = vpop.f32.mrf.mxu2 }
  0xff   : > { %v1162_v46 = vmax.f32 %v1154_v44, 0.0  ;;  %v921_v47 = vadd.f32 %v903_v19, %v816_v43  ;;  %v1007_v48 = vpop.f32.mrf.mxu3  ;;  %v801_v49 = vpop.f32.mrf.mxu1 }
 0x100   : > { %v817_v53 = vadd.f32 %v801_v49, %v715_v22 }
 0x101   : > { %1170 = vst [vmem:[%s1780_s21 + $0x10] sm:$0xff] %v1162_v46  ;;  %v1025_v20 = vadd.f32 %v1007_v48, %v921_v47 }
 0x102   : > { %v1112_v17 = vpop.f32.mrf.mxu0 }
 0x103   : > { %v1127_v51 = vadd.f32 %v1109_v16, %v1025_v20 }
 0x105   : > { %v1155_v54 = vadd.f32 %v1774_v52, %v1127_v51 }
 0x106   : > { %v906_v23 = vpop.f32.mrf.mxu2 }
 0x107   : > { %v1163_v57 = vmax.f32 %v1155_v54, 0.0  ;;  %v922_v61 = vadd.f32 %v906_v23, %v817_v53  ;;  %v1010_v62 = vpop.f32.mrf.mxu3  ;;  %v804_v55 = vpop.f32.mrf.mxu1 }
 0x108   : > { %v818_v1 = vadd.f32 %v804_v55, %v716_v21 }
 0x109   : > { %1171 = vst [vmem:[%s1780_s21 + $0x18] sm:$0xff] %v1163_v57  ;;  %v1026_v24 = vadd.f32 %v1010_v62, %v922_v61 }
 0x10a   : > { %v1115_v0 = vpop.f32.mrf.mxu0 }
 0x10b   : > { %v1128_v63 = vadd.f32 %v1112_v17, %v1026_v24 }
 0x10d   : > { %v1156_v4 = vadd.f32 %v1774_v52, %v1128_v63 }
 0x10e   : > { %v909_v27 = vpop.f32.mrf.mxu2 }
 0x10f   : > { %v1164_v6 = vmax.f32 %v1156_v4, 0.0  ;;  %v923_v7 = vadd.f32 %v909_v27, %v818_v1  ;;  %v1013_v8 = vpop.f32.mrf.mxu3  ;;  %v807_v59 = vpop.f32.mrf.mxu1 }
 0x110   : > { %v819_v11 = vadd.f32 %v807_v59, %v717_v30 }
 0x111   : > { %1172 = vst [vmem:[%s1780_s21 + $0x20] sm:$0xff] %v1164_v6  ;;  %v1027_v25 = vadd.f32 %v1013_v8, %v923_v7 }
 0x112   : > { %v1118_v31 = vpop.f32.mrf.mxu0 }
 0x113   : > { %v1129_v10 = vadd.f32 %v1115_v0, %v1027_v25 }
 0x115   : > { %v1157_v12 = vadd.f32 %v1774_v52, %v1129_v10 }
 0x116   : > { %v912_v14 = vpop.f32.mrf.mxu2 }
 0x117   : > { %v1165_v35 = vmax.f32 %v1157_v12, 0.0  ;;  %v924_v37 = vadd.f32 %v912_v14, %v819_v11  ;;  %v1016_v15 = vpop.f32.mrf.mxu3  ;;  %v810_v32 = vpop.f32.mrf.mxu1 }
 0x118   : > { %v820_v36 = vadd.f32 %v810_v32, %v718_v29 }
 0x119   : > { %1173 = vst [vmem:[%s1780_s21 + $0x28] sm:$0xff] %v1165_v35  ;;  %v1028_v3 = vadd.f32 %v1016_v15, %v924_v37 }
 0x11a   : > { %v1121_v18 = vpop.f32.mrf.mxu0 }
 0x11b   : > { %v1130_v39 = vadd.f32 %v1118_v31, %v1028_v3 }
 0x11d   : > { %v1158_v40 = vadd.f32 %v1774_v52, %v1130_v39 }
 0x11e   : > { %v915_v41 = vpop.f32.mrf.mxu2 }
 0x11f   : > { %v1166_v60 = vmax.f32 %v1158_v40, 0.0  ;;  %v925_v16 = vadd.f32 %v915_v41, %v820_v36  ;;  %v1019_v13 = vpop.f32.mrf.mxu3 }
 0x121   : > { %1174 = vst [vmem:[%s1780_s21 + $0x30] sm:$0xff] %v1166_v60  ;;  %v1029_v38 = vadd.f32 %v1019_v13, %v925_v16 }
 0x123   : > { %v1131_v42 = vadd.f32 %v1121_v18, %v1029_v38 }
 0x125   : > { %v1159_v43 = vadd.f32 %v1774_v52, %v1131_v42 }
 0x127   : > { %v1167_v44 = vmax.f32 %v1159_v43, 0.0 }
 0x129   : > { %1175 = vst [vmem:[%s1780_s21 + $0x38] sm:$0xff] %v1167_v44 }
 0x12a PF: > { %s13_s14 = sadd.s32 1, %s1484_s14   ;;  %s1832_s12 = smov %s1480_s13 }
 0x12b   : > { %p10_p6 = scmp.ge.s32.totalorder %s13_s14, 4   ;;  %s1833_s13 = smov %s1835_s15 }
 0x12d   :  { %12 = sbr.rel (!%p10_p6) target bundleno = 2 (0x2), region = 76 }

// kernel: residual_block_pallas.3
= control target key start
LH: loop header
LB: loop body
LE: loop exit
PB: predicated region body
PF: predicated region fallthrough
CT: control target
= control target key end

     0   :  { %s1698_s21 = smov 0   ;;  %s1700_s22 = smov 0   ;;  %s2415_s0 = inlined_call_operand.vmem [shape: f32[2,10,10,128], index: 0, kind: input, shape index: {}]   ;;  %s2416_s1 = inlined_call_operand.vmem [shape: f32[9,128,128], index: 1, kind: input, shape index: {}]   ;;  %s2417_s2 = inlined_call_operand.vmem [shape: f32[1,128], index: 2, kind: input, shape index: {}]   ;;  %s2418_s3 = inlined_call_operand.vmem [shape: f32[2,64,4], index: 3, kind: input, shape index: {}]   ;;  %s2419_s4 = inlined_call_operand.vmem [shape: f32[4,128], index: 4, kind: input, shape index: {}]   ;;  %s2420_s5 = inlined_call_operand.vmem [shape: f32[1,128], index: 5, kind: input, shape index: {}]   ;;  %s2421_s6 = inlined_call_operand.vmem [shape: f32[2,64,128], index: 6, kind: output, shape index: {}]  }
   0x1   :  { %s1702_s23 = smov 0  }
   0x2 LB: > { %s28_s24 = sadd.s32 1, %s1657_s22  ;;  %p1385_p0 = scmp.ge.s32.totalorder %s1661_s23, 1  ;;  %s1661_s23 = sphi %s1702_s23, %s16_s23   ;;  %s1657_s22 = sphi %s1700_s22, %s2423_s22   ;;  %s1653_s21 = sphi %s1698_s21, %s2422_s21  }
   0x3   : > { %p30_p1 = scmp.ge.s32.totalorder %s28_s24, 2  ;;  %p243_p2 = scmp.lt.s32.totalorder %s1661_s23, 3 }
   0x5   : > { %s2425_s24 = smov (%p30_p1, %s28_s24), 0  ;;  %p244_p3 = pnand %p1385_p0, %p243_p2 }
   0x6   : > { %p286_p4 = scmp.lt.s32.totalorder (!%p244_p3), %s1653_s21, 1 }
   0x7   : > { %247 = sbr.rel (%p244_p3) target bundleno = 347 (0x15b), region = 44 }
   0xc   : > { %v353_v0 = vld [vmem:[%s2416_s1 + $0x78] sm:$0xff]  ;;  %v352_v2 = vld [vmem:[%s2416_s1 + $0x70] sm:$0xff]  ;;  %v351_v4 = vld [vmem:[%s2416_s1 + $0x68] sm:$0xff]  ;;  %s2427_s21 = smov (!%p286_p4, %s1653_s21), 1  ;;  %vm1191_vm0 = vcmask 1043456   ;;  %vm1166_vm1 = vcmask 31744  }
   0xd   : > { %v1406_v1 = vld [vmem:[%s2416_s1 + $0xf8] sm:$0xff]  ;;  %1580 = vmatpush.msra.mxu2 %v353_v0  ;;  %v1405_v3 = vld [vmem:[%s2416_s1 + $0xf0] sm:$0xff]  ;;  %v1404_v5 = vld [vmem:[%s2416_s1 + $0xe8] sm:$0xff]  ;;  %354 = vmatpush.msra.mxu0 %v353_v0  ;;  %s1612_s13 = smul.u32 160, %s2427_s21  ;;  %s1578_s7 = sshll.u32 %s2427_s21, 6 }
   0xe   : > { %1596 = vmatpush.msra.mxu3 %v1406_v1  ;;  %444 = vmatpush.msra.mxu1 %v1406_v1  ;;  %v350_v6 = vld [vmem:[%s2416_s1 + $0x60] sm:$0xff]  ;;  %v349_v8 = vld [vmem:[%s2416_s1 + $0x58] sm:$0xff]  ;;  %v348_v10 = vld [vmem:[%s2416_s1 + $0x50] sm:$0xff]  ;;  %s2271_s10 = scalar_lea.vmem %s2418_s3, %s1578_s7  ;;  %s2363_s16 = scalar_lea.vmem %s2421_s6, %s1578_s7 }
   0xf   : > { %1581 = vmatpush.msra.mxu2 %v352_v2  ;;  %v1403_v7 = vld [vmem:[%s2416_s1 + $0xe0] sm:$0xff]  ;;  %355 = vmatpush.msra.mxu0 %v352_v2  ;;  %v1402_v9 = vld [vmem:[%s2416_s1 + $0xd8] sm:$0xff]  ;;  %v1401_v11 = vld [vmem:[%s2416_s1 + $0xd0] sm:$0xff]  ;;  %s1816_s28 = scalar_lea.vmem %s2415_s0, %s1612_s13 }
  0x10   : > { %1597 = vmatpush.msra.mxu3 %v1405_v3  ;;  %445 = vmatpush.msra.mxu1 %v1405_v3  ;;  %v347_v12 = vld [vmem:[%s2416_s1 + $0x48] sm:$0xff]  ;;  %v346_v14 = vld [vmem:[%s2416_s1 + $0x40] sm:$0xff]  ;;  %v345_v16 = vld [vmem:[%s2416_s1 + $0x38] sm:$0xff] }
  0x11   : > { %1582 = vmatpush.msra.mxu2 %v351_v4  ;;  %356 = vmatpush.msra.mxu0 %v351_v4  ;;  %v1400_v13 = vld [vmem:[%s2416_s1 + $0xc8] sm:$0xff]  ;;  %v1399_v15 = vld [vmem:[%s2416_s1 + $0xc0] sm:$0xff]  ;;  %v1398_v17 = vld [vmem:[%s2416_s1 + $0xb8] sm:$0xff] }
  0x12   : > { %1598 = vmatpush.msra.mxu3 %v1404_v5  ;;  %446 = vmatpush.msra.mxu1 %v1404_v5  ;;  %v344_v18 = vld [vmem:[%s2416_s1 + $0x30] sm:$0xff]  ;;  %v343_v20 = vld [vmem:[%s2416_s1 + $0x28] sm:$0xff]  ;;  %v342_v22 = vld [vmem:[%s2416_s1 + $0x20] sm:$0xff] }
  0x13   : > { %1583 = vmatpush.msra.mxu2 %v350_v6  ;;  %357 = vmatpush.msra.mxu0 %v350_v6  ;;  %v1397_v19 = vld [vmem:[%s2416_s1 + $0xb0] sm:$0xff]  ;;  %v1396_v21 = vld [vmem:[%s2416_s1 + $0xa8] sm:$0xff]  ;;  %v1395_v23 = vld [vmem:[%s2416_s1 + $0xa0] sm:$0xff] }
  0x14   : > { %1599 = vmatpush.msra.mxu3 %v1403_v7  ;;  %447 = vmatpush.msra.mxu1 %v1403_v7  ;;  %v341_v24 = vld [vmem:[%s2416_s1 + $0x18] sm:$0xff]  ;;  %v340_v26 = vld [vmem:[%s2416_s1 + $0x10] sm:$0xff]  ;;  %v339_v28 = vld [vmem:[%s2416_s1 + $0x8] sm:$0xff] }
  0x15   : > { %1584 = vmatpush.msra.mxu2 %v349_v8  ;;  %358 = vmatpush.msra.mxu0 %v349_v8  ;;  %v1394_v25 = vld [vmem:[%s2416_s1 + $0x98] sm:$0xff]  ;;  %v1393_v27 = vld [vmem:[%s2416_s1 + $0x90] sm:$0xff]  ;;  %v1392_v29 = vld [vmem:[%s2416_s1 + $0x88] sm:$0xff] }
  0x16   : > { %1600 = vmatpush.msra.mxu3 %v1402_v9  ;;  %448 = vmatpush.msra.mxu1 %v1402_v9  ;;  %v338_v30 = vld [vmem:[%s2416_s1] sm:$0xff]  ;;  %v1422_v34 = vld [vmem:[%s2416_s1 + $0x178] sm:$0xff]  ;;  %v1421_v36 = vld [vmem:[%s2416_s1 + $0x170] sm:$0xff] }
  0x17   : > { %1585 = vmatpush.msra.mxu2 %v348_v10  ;;  %359 = vmatpush.msra.mxu0 %v348_v10  ;;  %v1391_v31 = vld [vmem:[%s2416_s1 + $0x80] sm:$0xff]  ;;  %v1446_v35 = vld [vmem:[%s2416_s1 + $0x1f8] sm:$0xff]  ;;  %v1445_v37 = vld [vmem:[%s2416_s1 + $0x1f0] sm:$0xff] }
  0x18   : > { %1601 = vmatpush.msra.mxu3 %v1401_v11  ;;  %449 = vmatpush.msra.mxu1 %v1401_v11  ;;  %v1825_v32 = vld [vmem:[%s1816_s28 + $0x40] sm:$0xff]  ;;  %v1420_v40 = vld [vmem:[%s2416_s1 + $0x168] sm:$0xff]  ;;  %v1470_v42 = vld [vmem:[%s2416_s1 + $0x278] sm:$0xff] }
  0x19   : > { %1586 = vmatpush.msra.mxu2 %v347_v12  ;;  %360 = vmatpush.msra.mxu0 %v347_v12  ;;  %v1828_v33 = vld [vmem:[%s1816_s28 + $0x41] sm:$0xff]  ;;  %v1494_v43 = vld [vmem:[%s2416_s1 + $0x2f8] sm:$0xff]  ;;  %v1865_v46 = vld [vmem:[%s1816_s28 + $0x50] sm:$0xff] }
  0x1a   : > { %1602 = vmatpush.msra.mxu3 %v1400_v13  ;;  %450 = vmatpush.msra.mxu1 %v1400_v13  ;;  %v322_v38 = vld [vmem:[%s1816_s28] sm:$0xff]  ;;  %v1444_v41 = vld [vmem:[%s2416_s1 + $0x1e8] sm:$0xff]  ;;  %v1868_v47 = vld [vmem:[%s1816_s28 + $0x51] sm:$0xff] }
  0x1b   : > { %1587 = vmatpush.msra.mxu2 %v346_v14  ;;  %361 = vmatpush.msra.mxu0 %v346_v14  ;;  %v411_v39 = vld [vmem:[%s1816_s28 + $0x1] sm:$0xff]  ;;  %v1418_v48 = vld [vmem:[%s2416_s1 + $0x158] sm:$0xff]  ;;  %v1469_v50 = vld [vmem:[%s2416_s1 + $0x270] sm:$0xff] }
  0x1c   : > { %1603 = vmatpush.msra.mxu3 %v1399_v15  ;;  %451 = vmatpush.msra.mxu1 %v1399_v15  ;;  %v1419_v44 = vld [vmem:[%s2416_s1 + $0x160] sm:$0xff]  ;;  %v1442_v49 = vld [vmem:[%s2416_s1 + $0x1d8] sm:$0xff]  ;;  %v1493_v51 = vld [vmem:[%s2416_s1 + $0x2f0] sm:$0xff] }
  0x1d   : > { %1588 = vmatpush.msra.mxu2 %v345_v16  ;;  %362 = vmatpush.msra.mxu0 %v345_v16  ;;  %v1443_v45 = vld [vmem:[%s2416_s1 + $0x1e0] sm:$0xff]  ;;  %v1417_v52 = vld [vmem:[%s2416_s1 + $0x150] sm:$0xff]  ;;  %v1468_v54 = vld [vmem:[%s2416_s1 + $0x268] sm:$0xff] }
  0x1e   : > { %1604 = vmatpush.msra.mxu3 %v1398_v17  ;;  %452 = vmatpush.msra.mxu1 %v1398_v17  ;;  %v1441_v53 = vld [vmem:[%s2416_s1 + $0x1d0] sm:$0xff]  ;;  %v1492_v55 = vld [vmem:[%s2416_s1 + $0x2e8] sm:$0xff]  ;;  %v1467_v58 = vld [vmem:[%s2416_s1 + $0x260] sm:$0xff] }
  0x1f   : > { %1589 = vmatpush.msra.mxu2 %v344_v18  ;;  %363 = vmatpush.msra.mxu0 %v344_v18  ;;  %v1416_v56 = vld [vmem:[%s2416_s1 + $0x148] sm:$0xff]  ;;  %v1906_v59 = vld [vmem:[%s1816_s28 + $0x11] sm:$0xff]  ;;  %v1415_v60 = vld [vmem:[%s2416_s1 + $0x140] sm:$0xff] }
  0x20   : > { %1605 = vmatpush.msra.mxu3 %v1397_v19  ;;  %453 = vmatpush.msra.mxu1 %v1397_v19  ;;  %v1440_v57 = vld [vmem:[%s2416_s1 + $0x1c8] sm:$0xff]  ;;  %v1439_v61 = vld [vmem:[%s2416_s1 + $0x1c0] sm:$0xff]  ;;  %v1414_v0 = vld [vmem:[%s2416_s1 + $0x138] sm:$0xff] }
  0x21   : > { %1590 = vmatpush.msra.mxu2 %v343_v20  ;;  %364 = vmatpush.msra.mxu0 %v343_v20  ;;  %v1915_v62 = vld [vmem:[%s1816_s28 + $0x60] sm:$0xff]  ;;  %v1924_v1 = vld [vmem:[%s1816_s28 + $0x10] sm:$0xff]  ;;  %v1438_v2 = vld [vmem:[%s2416_s1 + $0x1b8] sm:$0xff] }
  0x22   : > { %1606 = vmatpush.msra.mxu3 %v1396_v21  ;;  %454 = vmatpush.msra.mxu1 %v1396_v21  ;;  %v1918_v63 = vld [vmem:[%s1816_s28 + $0x61] sm:$0xff]  ;;  %v1466_v3 = vld [vmem:[%s2416_s1 + $0x258] sm:$0xff]  ;;  %v1413_v4 = vld [vmem:[%s2416_s1 + $0x130] sm:$0xff] }
  0x23   : > { %1591 = vmatpush.msra.mxu2 %v342_v22  ;;  %365 = vmatpush.msra.mxu0 %v342_v22  ;;  %v1491_v5 = vld [vmem:[%s2416_s1 + $0x2e0] sm:$0xff]  ;;  %v1437_v6 = vld [vmem:[%s2416_s1 + $0x1b0] sm:$0xff]  ;;  %v1412_v8 = vld [vmem:[%s2416_s1 + $0x128] sm:$0xff] }
  0x24   : > { %1607 = vmatpush.msra.mxu3 %v1395_v23  ;;  %455 = vmatpush.msra.mxu1 %v1395_v23  ;;  %v1465_v7 = vld [vmem:[%s2416_s1 + $0x250] sm:$0xff]  ;;  %v1490_v9 = vld [vmem:[%s2416_s1 + $0x2d8] sm:$0xff]  ;;  %v1436_v10 = vld [vmem:[%s2416_s1 + $0x1a8] sm:$0xff] }
  0x25   : > { %1592 = vmatpush.msra.mxu2 %v341_v24  ;;  %366 = vmatpush.msra.mxu0 %v341_v24  ;;  %v1464_v11 = vld [vmem:[%s2416_s1 + $0x248] sm:$0xff]  ;;  %v1411_v12 = vld [vmem:[%s2416_s1 + $0x120] sm:$0xff]  ;;  %v1489_v13 = vld [vmem:[%s2416_s1 + $0x2d0] sm:$0xff] }
  0x26   : > { %1608 = vmatpush.msra.mxu3 %v1394_v25  ;;  %456 = vmatpush.msra.mxu1 %v1394_v25  ;;  %v1967_v14 = vld [vmem:[%s1816_s28 + $0x70] sm:$0xff]  ;;  %v1410_v16 = vld [vmem:[%s2416_s1 + $0x118] sm:$0xff]  ;;  %v1435_v17 = vld [vmem:[%s2416_s1 + $0x1a0] sm:$0xff] }
  0x27   : > { %1593 = vmatpush.msra.mxu2 %v340_v26  ;;  %367 = vmatpush.msra.mxu0 %v340_v26  ;;  %v1970_v15 = vld [vmem:[%s1816_s28 + $0x71] sm:$0xff]  ;;  %v1463_v18 = vld [vmem:[%s2416_s1 + $0x240] sm:$0xff]  ;;  %v1488_v19 = vld [vmem:[%s2416_s1 + $0x2c8] sm:$0xff] }
  0x28   : > { %1609 = vmatpush.msra.mxu3 %v1393_v27  ;;  %457 = vmatpush.msra.mxu1 %v1393_v27  ;;  %v1987_v20 = vld [vmem:[%s1816_s28 + $0x20] sm:$0xff]  ;;  %v1409_v22 = vld [vmem:[%s2416_s1 + $0x110] sm:$0xff]  ;;  %v1434_v23 = vld [vmem:[%s2416_s1 + $0x198] sm:$0xff] }
  0x29   : > { %1594 = vmatpush.msra.mxu2 %v339_v28  ;;  %368 = vmatpush.msra.mxu0 %v339_v28  ;;  %v1990_v21 = vld [vmem:[%s1816_s28 + $0x21] sm:$0xff]  ;;  %v1462_v24 = vld [vmem:[%s2416_s1 + $0x238] sm:$0xff]  ;;  %v1433_v27 = vld [vmem:[%s2416_s1 + $0x190] sm:$0xff] }
  0x2a   : > { %1610 = vmatpush.msra.mxu3 %v1392_v29  ;;  %458 = vmatpush.msra.mxu1 %v1392_v29  ;;  %v1487_v25 = vld [vmem:[%s2416_s1 + $0x2c0] sm:$0xff]  ;;  %v1408_v26 = vld [vmem:[%s2416_s1 + $0x108] sm:$0xff]  ;;  %v1461_v28 = vld [vmem:[%s2416_s1 + $0x230] sm:$0xff] }
  0x2b   : > { %1595 = vmatpush.msra.mxu2 %v338_v30  ;;  %369 = vmatpush.msra.mxu0 %v338_v30  ;;  %v1486_v29 = vld [vmem:[%s2416_s1 + $0x2b8] sm:$0xff]  ;;  %v1407_v30 = vld [vmem:[%s2416_s1 + $0x100] sm:$0xff] }
  0x2c   : > { %1611 = vmatpush.msra.mxu3 %v1391_v31  ;;  %382 = vmatmul.f32.vlgmr.msra.gmra.mxu2 %v1825_v32 }
  0x2d   : > { %472 = vmatmul.f32.vlgmr.msra.gmra.mxu3 %v1828_v33  ;;  %534 = vmatpush.msrb.mxu2 %v1422_v34  ;;  %v1460_v34 = vld [vmem:[%s2416_s1 + $0x228] sm:$0xff] }
  0x2e   : > { %627 = vmatpush.msrb.mxu3 %v1446_v35  ;;  %459 = vmatpush.msra.mxu1 %v1391_v31  ;;  %v1432_v31 = vld [vmem:[%s2416_s1 + $0x188] sm:$0xff]  ;;  %v1485_v35 = vld [vmem:[%s2416_s1 + $0x2b0] sm:$0xff] }
  0x2f   : > { %535 = vmatpush.msrb.mxu2 %v1421_v36  ;;  %370 = vmatmul.f32.vlgmr.msra.gmra.mxu0 %v322_v38  ;;  %v501_v36 = vld [vmem:[%s1816_s28 + $0x2] sm:$0xff] }
  0x30   : > { %628 = vmatpush.msrb.mxu3 %v1445_v37  ;;  %460 = vmatmul.f32.vlgmr.msra.gmra.mxu1 %v411_v39  ;;  %v1431_v37 = vld [vmem:[%s2416_s1 + $0x180] sm:$0xff]  ;;  %v1518_v39 = vld [vmem:[%s2416_s1 + $0x378] sm:$0xff] }
  0x31   : > { %536 = vmatpush.msrb.mxu2 %v1420_v40  ;;  %717 = vmatpush.msrb.mxu0 %v1470_v42  ;;  %v1459_v38 = vld [vmem:[%s2416_s1 + $0x220] sm:$0xff]  ;;  %v1484_v40 = vld [vmem:[%s2416_s1 + $0x2a8] sm:$0xff]  ;;  %v2047_v42 = vld [vmem:[%s1816_s28 + $0x31] sm:$0xff] }
  0x32   : > { %629 = vmatpush.msrb.mxu3 %v1444_v41  ;;  %807 = vmatpush.msrb.mxu1 %v1494_v43  ;;  %v2044_v41 = vld [vmem:[%s1816_s28 + $0x30] sm:$0xff]  ;;  %v1458_v43 = vld [vmem:[%s2416_s1 + $0x218] sm:$0xff] }
  0x33   : > { %537 = vmatpush.msrb.mxu2 %v1419_v44  ;;  %718 = vmatpush.msrb.mxu0 %v1469_v50  ;;  %v1542_v44 = vld [vmem:[%s2416_s1 + $0x3f8] sm:$0xff]  ;;  %v1541_v50 = vld [vmem:[%s2416_s1 + $0x3f0] sm:$0xff] }
  0x34   : > { %630 = vmatpush.msrb.mxu3 %v1443_v45  ;;  %385 = vmatmul.f32.gmra.mxu2 %v1865_v46  ;;  %v1483_v45 = vld [vmem:[%s2416_s1 + $0x2a0] sm:$0xff] }
  0x35   : > { %475 = vmatmul.f32.gmra.mxu3 %v1868_v47  ;;  %538 = vmatpush.msrb.mxu2 %v1418_v48  ;;  %v1517_v48 = vld [vmem:[%s2416_s1 + $0x370] sm:$0xff] }
  0x36   : > { %631 = vmatpush.msrb.mxu3 %v1442_v49  ;;  %808 = vmatpush.msrb.mxu1 %v1493_v51  ;;  %v1457_v49 = vld [vmem:[%s2416_s1 + $0x210] sm:$0xff]  ;;  %v1482_v51 = vld [vmem:[%s2416_s1 + $0x298] sm:$0xff] }
  0x37   : > { %539 = vmatpush.msrb.mxu2 %v1417_v52  ;;  %719 = vmatpush.msrb.mxu0 %v1468_v54  ;;  %v1516_v52 = vld [vmem:[%s2416_s1 + $0x368] sm:$0xff]  ;;  %v502_v54 = vld [vmem:[%s1816_s28 + $0x12] sm:$0xff] }
  0x38   : > { %632 = vmatpush.msrb.mxu3 %v1441_v53  ;;  %809 = vmatpush.msrb.mxu1 %v1492_v55  ;;  %v1456_v53 = vld [vmem:[%s2416_s1 + $0x208] sm:$0xff]  ;;  %v1481_v55 = vld [vmem:[%s2416_s1 + $0x290] sm:$0xff] }
  0x39   : > { %540 = vmatpush.msrb.mxu2 %v1416_v56  ;;  %720 = vmatpush.msrb.mxu0 %v1467_v58  ;;  %v1540_v56 = vld [vmem:[%s2416_s1 + $0x3e8] sm:$0xff]  ;;  %v1515_v58 = vld [vmem:[%s2416_s1 + $0x360] sm:$0xff] }
  0x3a   : > { %633 = vmatpush.msrb.mxu3 %v1440_v57  ;;  %463 = vmatmul.f32.gmra.mxu1 %v1906_v59  ;;  %v1455_v57 = vld [vmem:[%s2416_s1 + $0x200] sm:$0xff] }
  0x3b   : > { %541 = vmatpush.msrb.mxu2 %v1415_v60  ;;  %373 = vmatmul.f32.gmra.mxu0 %v1924_v1  ;;  %v1480_v60 = vld [vmem:[%s2416_s1 + $0x288] sm:$0xff] }
  0x3c   : > { %634 = vmatpush.msrb.mxu3 %v1439_v61  ;;  %388 = vmatmul.f32.gmra.mxu2 %v1915_v62  ;;  %v1539_v61 = vld [vmem:[%s2416_s1 + $0x3e0] sm:$0xff] }
  0x3d   : > { %478 = vmatmul.f32.gmra.mxu3 %v1918_v63  ;;  %542 = vmatpush.msrb.mxu2 %v1414_v0  ;;  %v1566_v0 = vld [vmem:[%s2416_s1 + $0x478] sm:$0xff] }
  0x3e   : > { %635 = vmatpush.msrb.mxu3 %v1438_v2  ;;  %721 = vmatpush.msrb.mxu0 %v1466_v3  ;;  %v1514_v2 = vld [vmem:[%s2416_s1 + $0x358] sm:$0xff]  ;;  %v1565_v3 = vld [vmem:[%s2416_s1 + $0x470] sm:$0xff] }
  0x3f   : > { %543 = vmatpush.msrb.mxu2 %v1413_v4  ;;  %810 = vmatpush.msrb.mxu1 %v1491_v5  ;;  %v1165_v4 = vld [vmem:[%s2419_s4] sm:$0xf] }
  0x40   : > { %636 = vmatpush.msrb.mxu3 %v1437_v6  ;;  %722 = vmatpush.msrb.mxu0 %v1465_v7  ;;  %v2116_v5 = vld [vmem:[%s1816_s28 + $0x22] sm:$0xff]  ;;  %v1538_v6 = vld [vmem:[%s2416_s1 + $0x3d8] sm:$0xff]  ;;  %v1513_v7 = vld [vmem:[%s2416_s1 + $0x350] sm:$0xff] }
  0x41   : > { %544 = vmatpush.msrb.mxu2 %v1412_v8  ;;  %811 = vmatpush.msrb.mxu1 %v1490_v9  ;;  %v1537_v8 = vld [vmem:[%s2416_s1 + $0x3d0] sm:$0xff]  ;;  %v1563_v9 = vld [vmem:[%s2416_s1 + $0x460] sm:$0xff] }
  0x42   : > { %637 = vmatpush.msrb.mxu3 %v1436_v10  ;;  %723 = vmatpush.msrb.mxu0 %v1464_v11  ;;  %v1512_v10 = vld [vmem:[%s2416_s1 + $0x348] sm:$0xff] }
  0x43   : > { %545 = vmatpush.msrb.mxu2 %v1411_v12  ;;  %812 = vmatpush.msrb.mxu1 %v1489_v13  ;;  %v1536_v11 = vld [vmem:[%s2416_s1 + $0x3c8] sm:$0xff]  ;;  %v1562_v12 = vld [vmem:[%s2416_s1 + $0x458] sm:$0xff]  ;;  %v1511_v13 = vld [vmem:[%s2416_s1 + $0x340] sm:$0xff] }
  0x44   : > { %391 = vmatmul.f32.gmra.mxu2 %v1967_v14  ;;  %638 = vmatpush.msrb.mxu3 %v1435_v17  ;;  %v1561_v17 = vld [vmem:[%s2416_s1 + $0x450] sm:$0xff] }
  0x45   : > { %481 = vmatmul.f32.gmra.mxu3 %v1970_v15  ;;  %546 = vmatpush.msrb.mxu2 %v1410_v16  ;;  %v1535_v16 = vld [vmem:[%s2416_s1 + $0x3c0] sm:$0xff] }
  0x46   : > { %724 = vmatpush.msrb.mxu0 %v1463_v18  ;;  %813 = vmatpush.msrb.mxu1 %v1488_v19  ;;  %v2155_v18 = vld [vmem:[%s1816_s28 + $0x32] sm:$0xff] }
  0x47   : > { %376 = vmatmul.f32.gmra.mxu0 %v1987_v20  ;;  %466 = vmatmul.f32.gmra.mxu1 %v1990_v21  ;;  %v1510_v19 = vld [vmem:[%s2416_s1 + $0x338] sm:$0xff] }
  0x48   : > { %547 = vmatpush.msrb.mxu2 %v1409_v22  ;;  %639 = vmatpush.msrb.mxu3 %v1434_v23  ;;  %v1534_v22 = vld [vmem:[%s2416_s1 + $0x3b8] sm:$0xff]  ;;  %v1560_v23 = vld [vmem:[%s2416_s1 + $0x448] sm:$0xff] }
  0x49   : > { %725 = vmatpush.msrb.mxu0 %v1462_v24  ;;  %814 = vmatpush.msrb.mxu1 %v1487_v25  ;;  %v1509_v24 = vld [vmem:[%s2416_s1 + $0x330] sm:$0xff] }
  0x4a   : > { %548 = vmatpush.msrb.mxu2 %v1408_v26  ;;  %640 = vmatpush.msrb.mxu3 %v1433_v27  ;;  %v1533_v25 = vld [vmem:[%s2416_s1 + $0x3b0] sm:$0xff]  ;;  %v1559_v26 = vld [vmem:[%s2416_s1 + $0x440] sm:$0xff]  ;;  %v1508_v27 = vld [vmem:[%s2416_s1 + $0x328] sm:$0xff] }
  0x4b   : > { %726 = vmatpush.msrb.mxu0 %v1461_v28  ;;  %815 = vmatpush.msrb.mxu1 %v1486_v29  ;;  %v1532_v28 = vld [vmem:[%s2416_s1 + $0x3a8] sm:$0xff]  ;;  %v1558_v29 = vld [vmem:[%s2416_s1 + $0x438] sm:$0xff] }
  0x4c   : > { %549 = vmatpush.msrb.mxu2 %v1407_v30  ;;  %641 = vmatpush.msrb.mxu3 %v1432_v31  ;;  %v1507_v30 = vld [vmem:[%s2416_s1 + $0x320] sm:$0xff] }
  0x4d   : > { %727 = vmatpush.msrb.mxu0 %v1460_v34  ;;  %816 = vmatpush.msrb.mxu1 %v1485_v35  ;;  %v2192_v31 = vld [vmem:[%s1816_s28 + $0x42] sm:$0xff]  ;;  %v1557_v35 = vld [vmem:[%s2416_s1 + $0x430] sm:$0xff] }
  0x4e   : > { %550 = vmatmul.f32.vlgmr.msrb.gmra.mxu2 %v501_v36  ;;  %642 = vmatpush.msrb.mxu3 %v1431_v37  ;;  %v1531_v34 = vld [vmem:[%s2416_s1 + $0x3a0] sm:$0xff]  ;;  %v1506_v36 = vld [vmem:[%s2416_s1 + $0x318] sm:$0xff] }
  0x4f   : > { %728 = vmatpush.msrb.mxu0 %v1459_v38  ;;  %900 = vmatpush.msra.mxu2 %v1518_v39  ;;  %v1530_v37 = vld [vmem:[%s2416_s1 + $0x398] sm:$0xff]  ;;  %v1556_v38 = vld [vmem:[%s2416_s1 + $0x428] sm:$0xff]  ;;  %v1505_v39 = vld [vmem:[%s2416_s1 + $0x310] sm:$0xff] }
  0x50   : > { %817 = vmatpush.msrb.mxu1 %v1484_v40  ;;  %379 = vmatmul.f32.gmra.mxu0 %v2044_v41  ;;  %v1529_v40 = vld [vmem:[%s2416_s1 + $0x390] sm:$0xff] }
  0x51   : > { %469 = vmatmul.f32.gmra.mxu1 %v2047_v42  ;;  %643 = vmatmul.f32.vlgmr.msrb.gmra.mxu3 %v1924_v1  ;;  %v1479_v1 = vld [vmem:[%s2416_s1 + $0x280] sm:$0xff] }
  0x52   : > { %729 = vmatpush.msrb.mxu0 %v1458_v43  ;;  %990 = vmatpush.msra.mxu3 %v1542_v44  ;;  %v1555_v43 = vld [vmem:[%s2416_s1 + $0x420] sm:$0xff]  ;;  %v1504_v44 = vld [vmem:[%s2416_s1 + $0x308] sm:$0xff] }
  0x53   : > { %818 = vmatpush.msrb.mxu1 %v1483_v45  ;;  %901 = vmatpush.msra.mxu2 %v1517_v48  ;;  %v1528_v45 = vld [vmem:[%s2416_s1 + $0x388] sm:$0xff]  ;;  %v1554_v48 = vld [vmem:[%s2416_s1 + $0x418] sm:$0xff] }
  0x54   : > { %730 = vmatpush.msrb.mxu0 %v1457_v49  ;;  %991 = vmatpush.msra.mxu3 %v1541_v50  ;;  %v2232_v49 = vld [vmem:[%s1816_s28 + $0x52] sm:$0xff]  ;;  %v1503_v50 = vld [vmem:[%s2416_s1 + $0x300] sm:$0xff] }
  0x55   : > { %819 = vmatpush.msrb.mxu1 %v1482_v51  ;;  %902 = vmatpush.msra.mxu2 %v1516_v52  ;;  %v1527_v51 = vld [vmem:[%s2416_s1 + $0x380] sm:$0xff]  ;;  %v1553_v52 = vld [vmem:[%s2416_s1 + $0x410] sm:$0xff] }
  0x56   : > { %731 = vmatpush.msrb.mxu0 %v1456_v53  ;;  %553 = vmatmul.f32.gmra.mxu2 %v502_v54  ;;  %v1552_v53 = vld [vmem:[%s2416_s1 + $0x408] sm:$0xff] }
  0x57   : > { %820 = vmatpush.msrb.mxu1 %v1481_v55  ;;  %992 = vmatpush.msra.mxu3 %v1540_v56  ;;  %v507_v55 = vld [vmem:[%s1816_s28 + $0x62] sm:$0xff]  ;;  %v508_v56 = vld [vmem:[%s1816_s28 + $0x72] sm:$0xff] }
  0x58   : > { %732 = vmatpush.msrb.mxu0 %v1455_v57  ;;  %903 = vmatpush.msra.mxu2 %v1515_v58  ;;  %v1430_v57 = vld [vmem:[%s1816_s28 + $0x80] sm:$0xff] }
  0x59   : > { %821 = vmatpush.msrb.mxu1 %v1480_v60  ;;  %646 = vmatmul.f32.gmra.mxu3 %v1987_v20  ;;  %v1454_v58 = vld [vmem:[%s1816_s28 + $0x81] sm:$0xff] }
  0x5a   : > { %733 = vmatmul.f32.vlgmr.msrb.gmra.mxu0 %v1906_v59  ;;  %993 = vmatpush.msra.mxu3 %v1539_v61  ;;  %v1564_v59 = vld [vmem:[%s2416_s1 + $0x468] sm:$0xff] }
  0x5b   : > { %1080 = vmatpush.msra.mxu0 %v1566_v0  ;;  %822 = vmatpush.msrb.mxu1 %v1479_v1  ;;  %v1478_v60 = vld [vmem:[%s1816_s28 + $0x82] sm:$0xff] }
  0x5c   : > { %823 = vmatmul.f32.vlgmr.msrb.gmra.mxu1 %v502_v54  ;;  %904 = vmatpush.msra.mxu2 %v1514_v2  ;;  %v1551_v54 = vld [vmem:[%s2416_s1 + $0x400] sm:$0xff] }
  0x5d   : > { %1081 = vmatpush.msra.mxu0 %v1565_v3  ;;  %1567 = vmatpush.msk.msra.mxu1 %vm1191_vm0, %v1165_v4  ;;  %v1161_v4 = vld [vmem:[%s2271_s10 + $0x20] sm:$0xff] }
  0x5e   : > { %556 = vmatmul.f32.gmra.mxu2 %v2116_v5  ;;  %994 = vmatpush.msra.mxu3 %v1538_v6 }
  0x5f   : > { %1082 = vmatpush.msra.mxu0 %v1564_v59  ;;  %905 = vmatpush.msra.mxu2 %v1513_v7  ;;  %v1162_v7 = vld [vmem:[%s2271_s10 + $0x28] sm:$0xff] }
  0x60   : > { %995 = vmatpush.msra.mxu3 %v1537_v8  ;;  %v1502_v8 = vld [vmem:[%s1816_s28 + $0x90] sm:$0xff] }
  0x61   : > { %649 = vmatmul.f32.gmra.mxu3 %v2044_v41  ;;  %1083 = vmatpush.msra.mxu0 %v1563_v9 }
  0x62   : > { %736 = vmatmul.f32.gmra.mxu0 %v1990_v21  ;;  %906 = vmatpush.msra.mxu2 %v1512_v10 }
  0x63   : > { %996 = vmatpush.msra.mxu3 %v1536_v11  ;;  %1084 = vmatpush.msra.mxu0 %v1562_v12  ;;  %v1526_v11 = vld [vmem:[%s1816_s28 + $0x91] sm:$0xff] }
  0x64   : > { %826 = vmatmul.f32.gmra.mxu1 %v2116_v5  ;;  %907 = vmatpush.msra.mxu2 %v1511_v13 }
  0x65   : > { %997 = vmatpush.msra.mxu3 %v1535_v16  ;;  %1085 = vmatpush.msra.mxu0 %v1561_v17  ;;  %v1163_v17 = vld [vmem:[%s2271_s10 + $0x30] sm:$0xff] }
  0x66   : > { %559 = vmatmul.f32.gmra.mxu2 %v2155_v18 }
  0x67   : > { %908 = vmatpush.msra.mxu2 %v1510_v19  ;;  %998 = vmatpush.msra.mxu3 %v1534_v22 }
  0x68   : > { %1086 = vmatpush.msra.mxu0 %v1560_v23  ;;  %v1550_v23 = vld [vmem:[%s1816_s28 + $0x92] sm:$0xff] }
  0x69   : > { %652 = vmatmul.f32.gmra.mxu3 %v1825_v32  ;;  %909 = vmatpush.msra.mxu2 %v1509_v24 }
  0x6a   : > { %739 = vmatmul.f32.gmra.mxu0 %v2047_v42  ;;  %999 = vmatpush.msra.mxu3 %v1533_v25  ;;  %v1164_v25 = vld [vmem:[%s2271_s10 + $0x38] sm:$0xff] }
  0x6b   : > { %1087 = vmatpush.msra.mxu0 %v1559_v26  ;;  %910 = vmatpush.msra.mxu2 %v1508_v27 }
  0x6c   : > { %829 = vmatmul.f32.gmra.mxu1 %v2155_v18  ;;  %1000 = vmatpush.msra.mxu3 %v1532_v28 }
  0x6d   : > { %1088 = vmatpush.msra.mxu0 %v1558_v29  ;;  %911 = vmatpush.msra.mxu2 %v1507_v30 }
  0x6e   : > { %562 = vmatmul.f32.gmra.mxu2 %v2192_v31  ;;  %1001 = vmatpush.msra.mxu3 %v1531_v34 }
  0x6f   : > { %1089 = vmatpush.msra.mxu0 %v1557_v35  ;;  %912 = vmatpush.msra.mxu2 %v1506_v36 }
  0x70   : > { %1002 = vmatpush.msra.mxu3 %v1530_v37 }
  0x71   : > { %655 = vmatmul.f32.gmra.mxu3 %v1865_v46  ;;  %1090 = vmatpush.msra.mxu0 %v1556_v38 }
  0x72   : > { %742 = vmatmul.f32.gmra.mxu0 %v1828_v33  ;;  %913 = vmatpush.msra.mxu2 %v1505_v39 }
  0x73   : > { %1003 = vmatpush.msra.mxu3 %v1529_v40  ;;  %1091 = vmatpush.msra.mxu0 %v1555_v43 }
  0x74   : > { %832 = vmatmul.f32.gmra.mxu1 %v2192_v31  ;;  %914 = vmatpush.msra.mxu2 %v1504_v44 }
  0x75   : > { %1004 = vmatpush.msra.mxu3 %v1528_v45  ;;  %1092 = vmatpush.msra.mxu0 %v1554_v48 }
  0x76   : > { %565 = vmatmul.f32.gmra.mxu2 %v2232_v49 }
  0x77   : > { %915 = vmatpush.msra.mxu2 %v1503_v50  ;;  %1005 = vmatpush.msra.mxu3 %v1527_v51 }
  0x78   : > { %1093 = vmatpush.msra.mxu0 %v1553_v52 }
  0x79   : > { %658 = vmatmul.f32.gmra.mxu3 %v1915_v62 }
  0x7a   : > { %745 = vmatmul.f32.gmra.mxu0 %v1868_v47 }
  0x7b   : > { %1094 = vmatpush.msra.mxu0 %v1552_v53 }
  0x7c   : > { %835 = vmatmul.f32.gmra.mxu1 %v2232_v49 }
  0x7d   : > { %1095 = vmatpush.msra.mxu0 %v1551_v54 }
  0x7e   : > { %568 = vmatmul.f32.gmra.mxu2 %v507_v55 }
  0x81   : > { %661 = vmatmul.f32.gmra.mxu3 %v1967_v14 }
  0x82   : > { %748 = vmatmul.f32.gmra.mxu0 %v1918_v63 }
  0x84   : > { %838 = vmatmul.f32.gmra.mxu1 %v507_v55 }
  0x86   : > { %571 = vmatmul.f32.gmra.mxu2 %v508_v56 }
  0x89   : > { %664 = vmatmul.f32.gmra.mxu3 %v1430_v57 }
  0x8a   : > { %751 = vmatmul.f32.gmra.mxu0 %v1970_v15 }
  0x8c   : > { %841 = vmatmul.f32.gmra.mxu1 %v508_v56 }
  0x8e   : > { %916 = vmatmul.f32.vlgmr.msra.gmra.mxu2 %v1987_v20  ;;  %v1157_v20 = vld [vmem:[%s2271_s10] sm:$0xff] }
  0x91   : > { %1006 = vmatmul.f32.vlgmr.msra.gmra.mxu3 %v1990_v21  ;;  %v1158_v21 = vld [vmem:[%s2271_s10 + $0x8] sm:$0xff] }
  0x92   : > { %754 = vmatmul.f32.gmra.mxu0 %v1454_v58 }
  0x94   : > { %844 = vmatmul.f32.gmra.mxu1 %v1478_v60 }
  0x96   : > { %919 = vmatmul.f32.gmra.mxu2 %v2044_v41  ;;  %v1159_v41 = vld [vmem:[%s2271_s10 + $0x10] sm:$0xff] }
  0x99   : > { %1009 = vmatmul.f32.gmra.mxu3 %v2047_v42 }
  0x9a   : > { %1096 = vmatmul.f32.vlgmr.msra.gmra.mxu0 %v2116_v5 }
  0x9c   : > { %1568 = vmatmul.msk.f32.vlgmr.msra.gmra.mxu1 %vm1166_vm1, %v1157_v20 }
  0x9e   : > { %922 = vmatmul.f32.gmra.mxu2 %v1825_v32 }
  0xa1   : > { %1012 = vmatmul.f32.gmra.mxu3 %v1828_v33 }
  0xa2   : > { %1099 = vmatmul.f32.gmra.mxu0 %v2155_v18 }
  0xa4   : > { %1569 = vmatmul.msk.f32.gmra.mxu1 %vm1166_vm1, %v1158_v21 }
  0xa6   : > { %925 = vmatmul.f32.gmra.mxu2 %v1865_v46  ;;  %v1160_v46 = vld [vmem:[%s2271_s10 + $0x18] sm:$0xff] }
  0xa9   : > { %1015 = vmatmul.f32.gmra.mxu3 %v1868_v47 }
  0xaa   : > { %1102 = vmatmul.f32.gmra.mxu0 %v2192_v31 }
  0xac   : > { %1570 = vmatmul.msk.f32.gmra.mxu1 %vm1166_vm1, %v1159_v41  ;;  %v371_v42 = vpop.f32.mrf.mxu0 }
  0xad   : > { %v461_v61 = vpop.f32.mrf.mxu1 }
  0xae   : > { %928 = vmatmul.f32.gmra.mxu2 %v1915_v62  ;;  %v2288_v32 = vadd.f32 %v461_v61, %v371_v42 }
  0xaf   : > { %v383_v33 = vpop.f32.mrf.mxu2 }
  0xb0   : > { %v473_v0 = vpop.f32.mrf.mxu3 }
  0xb1   : > { %v2290_v1 = vadd.f32 %v473_v0, %v383_v33  ;;  %1018 = vmatmul.f32.gmra.mxu3 %v1918_v63 }
  0xb2   : > { %1105 = vmatmul.f32.gmra.mxu0 %v2232_v49 }
  0xb4   : > { %1571 = vmatmul.msk.f32.gmra.mxu1 %vm1166_vm1, %v1160_v46 }
  0xb6   : > { %931 = vmatmul.f32.gmra.mxu2 %v1967_v14 }
  0xb7   : > { %v386_v47 = vpop.f32.mrf.mxu2  ;;  %v464_v3 = vpop.f32.mrf.mxu1 }
  0xb8   : > { %v476_v2 = vpop.f32.mrf.mxu3  ;;  %v374_v5 = vpop.f32.mrf.mxu0 }
  0xb9   : > { %v2297_v62 = vadd.f32 %v476_v2, %v386_v47  ;;  %1021 = vmatmul.f32.gmra.mxu3 %v1970_v15  ;;  %v486_v63 = vadd.f32 %v464_v3, %v374_v5 }
  0xba   : > { %1108 = vmatmul.f32.gmra.mxu0 %v507_v55 }
  0xbc   : > { %1572 = vmatmul.msk.f32.gmra.mxu1 %vm1166_vm1, %v1161_v4 }
  0xbe   : > { %934 = vmatmul.f32.gmra.mxu2 %v1430_v57 }
  0xbf   : > { %v389_v6 = vpop.f32.mrf.mxu2 }
  0xc0   : > { %v479_v59 = vpop.f32.mrf.mxu3 }
  0xc1   : > { %v2302_v14 = vadd.f32 %v479_v59, %v389_v6  ;;  %1024 = vmatmul.f32.gmra.mxu3 %v1454_v58  ;;  %v2349_v59 = vld [vmem:[%s2417_s2] ss:$0 sm:$0xff] }
  0xc2   : > { %1111 = vmatmul.f32.gmra.mxu0 %v508_v56 }
  0xc4   : > { %1573 = vmatmul.msk.f32.gmra.mxu1 %vm1166_vm1, %v1162_v7  ;;  %v377_v15 = vpop.f32.mrf.mxu0  ;;  %v467_v9 = vpop.f32.mrf.mxu1 }
  0xc5   : > { %v487_v10 = vadd.f32 %v467_v9, %v377_v15 }
  0xc6   : > { %937 = vmatmul.f32.gmra.mxu2 %v1502_v8 }
  0xc7   : > { %v392_v12 = vpop.f32.mrf.mxu2 }
  0xc8   : > { %v482_v13 = vpop.f32.mrf.mxu3 }
  0xc9   : > { %v2308_v16 = vadd.f32 %v482_v13, %v392_v12  ;;  %1027 = vmatmul.f32.gmra.mxu3 %v1526_v11 }
  0xca   : > { %1114 = vmatmul.f32.gmra.mxu0 %v1478_v60 }
  0xcc   : > { %1574 = vmatmul.msk.f32.gmra.mxu1 %vm1166_vm1, %v1163_v17 }
  0xcd   : > { %v380_v18 = vpop.f32.mrf.mxu0 }
  0xce   : > { %v470_v19 = vpop.f32.mrf.mxu1 }
  0xcf   : > { %v488_v22 = vadd.f32 %v470_v19, %v380_v18 }
  0xd1   : > { %v551_v24 = vpop.f32.mrf.mxu2 }
  0xd2   : > { %1117 = vmatmul.f32.gmra.mxu0 %v1550_v23  ;;  %v575_v56 = vadd.f32 %v551_v24, %v2288_v32 }
  0xd4   : > { %v644_v26 = vpop.f32.mrf.mxu3  ;;  %1575 = vmatmul.msk.f32.gmra.mxu1 %vm1166_vm1, %v1164_v25 }
  0xd5   : > { %v668_v60 = vadd.f32 %v644_v26, %v575_v56 }
  0xd7   : > { %v734_v27 = vpop.f32.mrf.mxu0 }
  0xd8   : > { %v758_v41 = vadd.f32 %v734_v27, %v668_v60 }
  0xd9   : > { %v824_v28 = vpop.f32.mrf.mxu1  ;;  %v554_v29 = vpop.f32.mrf.mxu2 }
  0xda   : > { %v576_v42 = vadd.f32 %v554_v29, %v486_v63  ;;  %v848_v0 = vadd.f32 %v824_v28, %v758_v41 }
  0xdc   : > { %v647_v30 = vpop.f32.mrf.mxu3 }
  0xdd   : > { %v669_v46 = vadd.f32 %v647_v30, %v576_v42 }
  0xdf   : > { %v737_v31 = vpop.f32.mrf.mxu0 }
  0xe0   : > { %v759_v3 = vadd.f32 %v737_v31, %v669_v46 }
  0xe1   : > { %v827_v34 = vpop.f32.mrf.mxu1  ;;  %v557_v35 = vpop.f32.mrf.mxu2 }
  0xe2   : > { %v577_v4 = vadd.f32 %v557_v35, %v487_v10  ;;  %v849_v7 = vadd.f32 %v827_v34, %v759_v3  ;;  %v2355_v10 = vld [vmem:[%s2420_s5] ss:$0 sm:$0xff] }
  0xe4   : > { %v650_v36 = vpop.f32.mrf.mxu3 }
  0xe5   : > { %v670_v8 = vadd.f32 %v650_v36, %v577_v4 }
  0xe7   : > { %v740_v37 = vpop.f32.mrf.mxu0 }
  0xe8   : > { %v760_v17 = vadd.f32 %v740_v37, %v670_v8 }
  0xe9   : > { %v830_v38 = vpop.f32.mrf.mxu1  ;;  %v560_v39 = vpop.f32.mrf.mxu2 }
  0xea   : > { %v578_v18 = vadd.f32 %v560_v39, %v488_v22  ;;  %v850_v27 = vadd.f32 %v830_v38, %v760_v17 }
  0xec   : > { %v653_v40 = vpop.f32.mrf.mxu3 }
  0xed   : > { %v671_v28 = vadd.f32 %v653_v40, %v578_v18 }
  0xef   : > { %v743_v43 = vpop.f32.mrf.mxu0 }
  0xf0   : > { %v761_v36 = vadd.f32 %v743_v43, %v671_v28 }
  0xf1   : > { %v2315_v44 = vpop.f32.mrf.mxu1  ;;  %v563_v45 = vpop.f32.mrf.mxu2 }
  0xf2   : > { %v579_v37 = vadd.f32 %v563_v45, %v2290_v1  ;;  %v851_v38 = vadd.f32 %v2315_v44, %v761_v36 }
  0xf4   : > { %v656_v48 = vpop.f32.mrf.mxu3 }
  0xf5   : > { %v672_v40 = vadd.f32 %v656_v48, %v579_v37 }
  0xf7   : > { %v2317_v49 = vpop.f32.mrf.mxu0 }
  0xf8   : > { %v762_v1 = vadd.f32 %v2317_v49, %v672_v40 }
  0xf9   : > { %v2319_v50 = vpop.f32.mrf.mxu1  ;;  %v2321_v51 = vpop.f32.mrf.mxu2 }
  0xfa   : > { %v580_v45 = vadd.f32 %v2321_v51, %v2297_v62 }
  0xfc   : > { %v2323_v52 = vpop.f32.mrf.mxu3 }
  0xff   : > { %v2325_v53 = vpop.f32.mrf.mxu0 }
 0x101   : > { %v2327_v54 = vpop.f32.mrf.mxu1  ;;  %v2329_v55 = vpop.f32.mrf.mxu2 }
 0x102   : > { %v581_v51 = vadd.f32 %v2329_v55, %v2302_v14 }
 0x104   : > { %v2332_v57 = vpop.f32.mrf.mxu3 }
 0x107   : > { %v2334_v58 = vpop.f32.mrf.mxu0 }
 0x109   : > { %v2336_v20 = vpop.f32.mrf.mxu1  ;;  %v2338_v21 = vpop.f32.mrf.mxu2 }
 0x10a   : > { %v582_v55 = vadd.f32 %v2338_v21, %v2308_v16 }
 0x10c   : > { %v2340_v61 = vpop.f32.mrf.mxu3 }
 0x10f   : > { %v2342_v33 = vpop.f32.mrf.mxu0 }
 0x111   : > { %v2344_v47 = vpop.f32.mrf.mxu1  ;;  %v917_v32 = vpop.f32.mrf.mxu2 }
 0x112   : > { %v941_v2 = vadd.f32 %v917_v32, %v848_v0 }
 0x114   : > { %v1007_v5 = vpop.f32.mrf.mxu3 }
 0x115   : > { %v1031_v6 = vadd.f32 %v1007_v5, %v941_v2 }
 0x117   : > { %v1097_v63 = vpop.f32.mrf.mxu0 }
 0x118   : > { %v1121_v15 = vadd.f32 %v1097_v63, %v1031_v6  ;;  %v852_v63 = vadd.f32 %v2319_v50, %v762_v1 }
 0x119   : > { %v920_v9 = vpop.f32.mrf.mxu2  ;;  %v1212_v11 = vpop.f32.mrf.mxu1 }
 0x11a   : > { %v942_v12 = vadd.f32 %v920_v9, %v849_v7  ;;  %v1149_v13 = vadd.f32 %v2349_v59, %v1121_v15  ;;  %v673_v7 = vadd.f32 %v2323_v52, %v580_v45 }
 0x11c   : > { %v1236_v19 = vadd.f32 %v1212_v11, %v1149_v13  ;;  %v1010_v23 = vpop.f32.mrf.mxu3  ;;  %v763_v62 = vadd.f32 %v2325_v53, %v673_v7 }
 0x11d   : > { %v1032_v24 = vadd.f32 %v1010_v23, %v942_v12  ;;  %v674_v23 = vadd.f32 %v2332_v57, %v581_v51 }
 0x11e   : > { %v1248_v25 = vadd.f32 %v2355_v10, %v1236_v19  ;;  %v853_v19 = vadd.f32 %v2327_v54, %v763_v62 }
 0x11f   : > { %v1100_v26 = vpop.f32.mrf.mxu0  ;;  %v764_v14 = vadd.f32 %v2334_v58, %v674_v23 }
 0x120   : > { %v1256_v29 = vmax.f32 %v1248_v25, 0.0  ;;  %v1122_v30 = vadd.f32 %v1100_v26, %v1032_v24 }
 0x121   : > { %v923_v31 = vpop.f32.mrf.mxu2  ;;  %v1215_v34 = vpop.f32.mrf.mxu1 }
 0x122   : > { %1264 = vst [vmem:[%s2363_s16] sm:$0xff] %v1256_v29  ;;  %v943_v22 = vadd.f32 %v923_v31, %v850_v27  ;;  %v1150_v35 = vadd.f32 %v2349_v59, %v1122_v30 }
 0x124   : > { %v1237_v39 = vadd.f32 %v1215_v34, %v1150_v35  ;;  %v1013_v56 = vpop.f32.mrf.mxu3  ;;  %v854_v34 = vadd.f32 %v2336_v20, %v764_v14 }
 0x125   : > { %v1033_v60 = vadd.f32 %v1013_v56, %v943_v22  ;;  %v675_v22 = vadd.f32 %v2340_v61, %v582_v55 }
 0x126   : > { %v1249_v41 = vadd.f32 %v2355_v10, %v1237_v39 }
 0x127   : > { %v1103_v42 = vpop.f32.mrf.mxu0  ;;  %v765_v16 = vadd.f32 %v2342_v33, %v675_v22 }
 0x128   : > { %v1257_v0 = vmax.f32 %v1249_v41, 0.0  ;;  %v1123_v46 = vadd.f32 %v1103_v42, %v1033_v60 }
 0x129   : > { %v926_v32 = vpop.f32.mrf.mxu2  ;;  %v1218_v2 = vpop.f32.mrf.mxu1  ;;  %v855_v20 = vadd.f32 %v2344_v47, %v765_v16 }
 0x12a   : > { %1265 = vst [vmem:[%s2363_s16 + $0x8] sm:$0xff] %v1257_v0  ;;  %v944_v3 = vadd.f32 %v926_v32, %v851_v38  ;;  %v1151_v43 = vadd.f32 %v2349_v59, %v1123_v46 }
 0x12c   : > { %v1238_v4 = vadd.f32 %v1218_v2, %v1151_v43  ;;  %v1016_v5 = vpop.f32.mrf.mxu3 }
 0x12d   : > { %v1034_v6 = vadd.f32 %v1016_v5, %v944_v3 }
 0x12e   : > { %v1250_v44 = vadd.f32 %v2355_v10, %v1238_v4 }
 0x12f   : > { %v1106_v48 = vpop.f32.mrf.mxu0 }
 0x130   : > { %v1258_v8 = vmax.f32 %v1250_v44, 0.0  ;;  %v1124_v15 = vadd.f32 %v1106_v48, %v1034_v6 }
 0x131   : > { %v929_v9 = vpop.f32.mrf.mxu2  ;;  %v1221_v11 = vpop.f32.mrf.mxu1 }
 0x132   : > { %1266 = vst [vmem:[%s2363_s16 + $0x10] sm:$0xff] %v1258_v8  ;;  %v945_v49 = vadd.f32 %v929_v9, %v852_v63  ;;  %v1152_v12 = vadd.f32 %v2349_v59, %v1124_v15 }
 0x134   : > { %v1239_v13 = vadd.f32 %v1221_v11, %v1152_v12  ;;  %v1019_v17 = vpop.f32.mrf.mxu3 }
 0x135   : > { %v1035_v18 = vadd.f32 %v1019_v17, %v945_v49 }
 0x136   : > { %v1251_v50 = vadd.f32 %v2355_v10, %v1239_v13 }
 0x137   : > { %v1109_v52 = vpop.f32.mrf.mxu0 }
 0x138   : > { %v1259_v24 = vmax.f32 %v1251_v50, 0.0  ;;  %v1125_v25 = vadd.f32 %v1109_v52, %v1035_v18 }
 0x139   : > { %v932_v26 = vpop.f32.mrf.mxu2  ;;  %v1224_v27 = vpop.f32.mrf.mxu1 }
 0x13a   : > { %1267 = vst [vmem:[%s2363_s16 + $0x18] sm:$0xff] %v1259_v24  ;;  %v946_v53 = vadd.f32 %v932_v26, %v853_v19  ;;  %v1153_v28 = vadd.f32 %v2349_v59, %v1125_v25 }
 0x13c   : > { %v1240_v29 = vadd.f32 %v1224_v27, %v1153_v28  ;;  %v1022_v30 = vpop.f32.mrf.mxu3 }
 0x13d   : > { %v1036_v31 = vadd.f32 %v1022_v30, %v946_v53 }
 0x13e   : > { %v1252_v54 = vadd.f32 %v2355_v10, %v1240_v29 }
 0x13f   : > { %v1112_v57 = vpop.f32.mrf.mxu0 }
 0x140   : > { %v1260_v35 = vmax.f32 %v1252_v54, 0.0  ;;  %v1126_v36 = vadd.f32 %v1112_v57, %v1036_v31 }
 0x141   : > { %v935_v37 = vpop.f32.mrf.mxu2  ;;  %v1227_v39 = vpop.f32.mrf.mxu1 }
 0x142   : > { %1268 = vst [vmem:[%s2363_s16 + $0x20] sm:$0xff] %v1260_v35  ;;  %v947_v58 = vadd.f32 %v935_v37, %v854_v34  ;;  %v1154_v56 = vadd.f32 %v2349_v59, %v1126_v36 }
 0x144   : > { %v1241_v21 = vadd.f32 %v1227_v39, %v1154_v56  ;;  %v1025_v60 = vpop.f32.mrf.mxu3 }
 0x145   : > { %v1037_v41 = vadd.f32 %v1025_v60, %v947_v58 }
 0x146   : > { %v1253_v42 = vadd.f32 %v2355_v10, %v1241_v21 }
 0x147   : > { %v1115_v38 = vpop.f32.mrf.mxu0 }
 0x148   : > { %v1261_v61 = vmax.f32 %v1253_v42, 0.0  ;;  %v1127_v40 = vadd.f32 %v1115_v38, %v1037_v41 }
 0x149   : > { %v938_v0 = vpop.f32.mrf.mxu2  ;;  %v1230_v46 = vpop.f32.mrf.mxu1 }
 0x14a   : > { %1269 = vst [vmem:[%s2363_s16 + $0x28] sm:$0xff] %v1261_v61  ;;  %v948_v32 = vadd.f32 %v938_v0, %v855_v20  ;;  %v1155_v2 = vadd.f32 %v2349_v59, %v1127_v40 }
 0x14c   : > { %v1242_v3 = vadd.f32 %v1230_v46, %v1155_v2  ;;  %v1028_v33 = vpop.f32.mrf.mxu3 }
 0x14d   : > { %v1038_v43 = vadd.f32 %v1028_v33, %v948_v32 }
 0x14e   : > { %v1254_v1 = vadd.f32 %v2355_v10, %v1242_v3 }
 0x14f   : > { %v1118_v45 = vpop.f32.mrf.mxu0 }
 0x150   : > { %v1262_v4 = vmax.f32 %v1254_v1, 0.0  ;;  %v1128_v5 = vadd.f32 %v1118_v45, %v1038_v43 }
 0x151   : > { %v1233_v6 = vpop.f32.mrf.mxu1 }
 0x152   : > { %1270 = vst [vmem:[%s2363_s16 + $0x30] sm:$0xff] %v1262_v4  ;;  %v1156_v47 = vadd.f32 %v2349_v59, %v1128_v5 }
 0x154   : > { %v1243_v44 = vadd.f32 %v1233_v6, %v1156_v47 }
 0x156   : > { %v1255_v48 = vadd.f32 %v2355_v10, %v1243_v44 }
 0x158   : > { %v1263_v63 = vmax.f32 %v1255_v48, 0.0 }
 0x15a   : > { %1271 = vst [vmem:[%s2363_s16 + $0x38] sm:$0xff] %v1263_v63 }
 0x15b PF: > { %s16_s23 = sadd.s32 1, %s1661_s23   ;;  %s2422_s21 = smov %s1657_s22 }
 0x15c   : > { %p13_p5 = scmp.ge.s32.totalorder %s16_s23, 4   ;;  %s2423_s22 = smov %s2425_s24 }
 0x15e   :  { %15 = sbr.rel (!%p13_p5) target bundleno = 2 (0x2), region = 88 }

</bundles_post_ra>
